<compile_context>
chip_gen: v5e
topology: v5e:2x2
jax: 0.10.0
libtpu: 0.0.40
codegen_flags: <defaults>
</compile_context>

<pallas_src>
import functools

import jax
import jax.numpy as jnp
import numpy as np
from jax.experimental import pallas as pl
from jax.experimental.pallas import tpu as pltpu


# ----------------------------------------------------------------------------
# Wrapper-side helpers (cheap, bandwidth-bound pre-pass handled by XLA)
# ----------------------------------------------------------------------------
def _avg_pool2(x):
    """AvgPool2d(2,2) on (nc, h, w) via reshape-mean."""
    nc, h, w = x.shape
    return x.reshape(nc, h // 2, 2, w // 2, 2).mean(axis=(2, 4))


def _vmem_budget_bytes():
    """~75% of physical VMEM (headroom for compiler scratch + double buffers)."""
    try:
        cap = int(pltpu.get_tpu_info().vmem_capacity_bytes)
    except Exception:
        cap = 64 * 2 ** 20          # conservative fallback: v7x per-TC VMEM
    return int(0.75 * cap)


def _pick_tile_nc(nc, level, h, w, budget):
    """Largest divisor of nc whose per-step working set fits the VMEM budget."""
    per_nc_pyramid = 4 * sum((h >> l) * (w >> l) for l in range(level))
    # 2 inputs x 2 pipeline buffers of the full pyramid + ~6 level-0 temporaries
    per_nc_cost = 4 * per_nc_pyramid + 6 * 4 * h * w
    for d in range(nc, 0, -1):
        if nc % d == 0 and d * per_nc_cost <= budget:
            return d
    return 1


# ----------------------------------------------------------------------------
# Pallas kernel: tanh-product loss partial sums for one NC tile, all levels
# ----------------------------------------------------------------------------
def _exclusion_kernel(level, alpha_ref, *refs):
    """
    alpha_ref            : SMEM (2*level,) f32, scalar-prefetched global alphas
    refs[:level]         : x1 pyramid blocks, (tile_nc, h_l, w_l) f32 in VMEM
    refs[level:2*level]  : x2 pyramid blocks
    refs[-2], refs[-1]   : gx / gy outputs, (1, level, tile_nc) f32
    """
    x1_refs = refs[:level]
    x2_refs = refs[level:2 * level]
    gx_ref, gy_ref = refs[2 * level], refs[2 * level + 1]

    for l in range(level):
        x1 = x1_refs[l][...]
        x2 = x2_refs[l][...]
        alphax = alpha_ref[2 * l]
        alphay = alpha_ref[2 * l + 1]

        # ---- X phase (gradient along H); temporaries dead before Y phase ----
        gx1 = x1[:, 1:, :] - x1[:, :-1, :]
        gx2 = x2[:, 1:, :] - x2[:, :-1, :]
        # sigmoid(z)*2 - 1 == tanh(z/2): one EUP op, no extra VPU mul/sub.
        sx = jnp.tanh(0.5 * gx1) * jnp.tanh((0.5 * alphax) * gx2)
        px = sx * sx
        gx_ref[0, l, :] = px.sum(axis=2).sum(axis=1)

        # ---- Y phase (gradient along W) ----
        gy1 = x1[:, :, 1:] - x1[:, :, :-1]
        gy2 = x2[:, :, 1:] - x2[:, :, :-1]
        sy = jnp.tanh(0.5 * gy1) * jnp.tanh((0.5 * alphay) * gy2)
        py = sy * sy
        gy_ref[0, l, :] = py.sum(axis=2).sum(axis=1)


# ----------------------------------------------------------------------------
# Public entry point
# ----------------------------------------------------------------------------
def exclusion_loss(img1, img2, level=3):
    """Pallas implementation of ExclusionLoss.forward (NCHW inputs)."""
    n, c, h, w = img1.shape
    assert img1.shape == img2.shape
    assert h % (1 << (level - 1)) == 0 and w % (1 << (level - 1)) == 0, (
        "H and W must be divisible by 2**(level-1) for the 2x2 avg-pool pyramid")
    nc = n * c
    x1 = img1.astype(jnp.float32).reshape(nc, h, w)
    x2 = img2.astype(jnp.float32).reshape(nc, h, w)

    # --- pre-pass (plain jnp): pooled pyramid + batch-global alpha scalars.
    # alpha couples the WHOLE batch, so it must exist before the NC-tiled
    # kernel runs; mean ratio == sum ratio because the element counts match.
    x1_levels, x2_levels = [x1], [x2]
    for _ in range(level - 1):
        x1_levels.append(_avg_pool2(x1_levels[-1]))
        x2_levels.append(_avg_pool2(x2_levels[-1]))

    alphas = []
    for l in range(level):
        a1, a2 = x1_levels[l], x2_levels[l]
        # NOTE: like the PyTorch reference, the denominator is unguarded (a
        # constant img2 yields Inf/NaN) — kept for exact parity.
        alphax = 2.0 * jnp.sum(jnp.abs(a1[:, 1:, :] - a1[:, :-1, :])) / \
                 jnp.sum(jnp.abs(a2[:, 1:, :] - a2[:, :-1, :]))
        alphay = 2.0 * jnp.sum(jnp.abs(a1[:, :, 1:] - a1[:, :, :-1])) / \
                 jnp.sum(jnp.abs(a2[:, :, 1:] - a2[:, :, :-1]))
        alphas += [alphax, alphay]
    alphas = jnp.stack(alphas).astype(jnp.float32)            # (2*level,)

    # --- Pallas pass: NC-tiled, all levels in one launch, alphas in SMEM.
    budget = _vmem_budget_bytes()
    tile_nc = _pick_tile_nc(nc, level, h, w, budget)
    nc_tiles = nc // tile_nc

    def _img_spec(hl, wl):
        # index_map receives (grid_idx, *scalar_prefetch_refs)
        return pl.BlockSpec((tile_nc, hl, wl), lambda i, a: (i, 0, 0))

    in_specs = [_img_spec(h >> l, w >> l) for l in range(level)]   # x1 pyramid
    in_specs += [_img_spec(h >> l, w >> l) for l in range(level)]  # x2 pyramid

    # Output blocks cover the full last-two dims -> no partial-store masking
    # and no (8,128) divisibility concerns regardless of tile_nc.
    out_spec = pl.BlockSpec((1, level, tile_nc), lambda i, a: (i, 0, 0))
    out_shape = (jax.ShapeDtypeStruct((nc_tiles, level, tile_nc), jnp.float32),
                 jax.ShapeDtypeStruct((nc_tiles, level, tile_nc), jnp.float32))

    elems = nc * sum((h >> l) * (w >> l) for l in range(level))
    cost = pl.CostEstimate(flops=int(20 * elems),
                           transcendentals=int(4 * elems),
                           bytes_accessed=int(2 * elems * 4 + 2 * nc * level * 4))

    gx_sums, gy_sums = pl.pallas_call(
        functools.partial(_exclusion_kernel, level),
        out_shape=out_shape,
        grid_spec=pltpu.PrefetchScalarGridSpec(
            num_scalar_prefetch=1,
            grid=(nc_tiles,),
            in_specs=in_specs,
            out_specs=(out_spec, out_spec)),
        compiler_params=pltpu.CompilerParams(
            # NC tiles are independent -> megacore sharding on v7x.
            dimension_semantics=("parallel",),
            vmem_limit_bytes=budget),
        cost_estimate=cost,
    )(alphas, *x1_levels, *x2_levels)

    # --- tiny glue: fold channels, normalize by the valid count, ** 0.25
    gradx_loss, grady_loss = [], []
    for l in range(level):
        hl, wl = h >> l, w >> l
        gx = gx_sums[:, l, :].reshape(n, c).sum(axis=1) / (c * (hl - 1) * wl)
        gy = gy_sums[:, l, :].reshape(n, c).sum(axis=1) / (c * hl * (wl - 1))
        gradx_loss.append(gx ** 0.25)
        grady_loss.append(gy ** 0.25)
    return gradx_loss, grady_loss


# ----------------------------------------------------------------------------
# Pure-JAX reference (mirrors the PyTorch module) for correctness checking
# ----------------------------------------------------------------------------
def _ref_exclusion_loss(img1, img2, level=3):
    gradx_loss, grady_loss = [], []
    for _ in range(level):
        gx1 = img1[:, :, 1:, :] - img1[:, :, :-1, :]
        gy1 = img1[:, :, :, 1:] - img1[:, :, :, :-1]
        gx2 = img2[:, :, 1:, :] - img2[:, :, :-1, :]
        gy2 = img2[:, :, :, 1:] - img2[:, :, :, :-1]
        alphax = 2.0 * jnp.mean(jnp.abs(gx1)) / jnp.mean(jnp.abs(gx2))
        alphay = 2.0 * jnp.mean(jnp.abs(gy1)) / jnp.mean(jnp.abs(gy2))
        gx1_s = jax.nn.sigmoid(gx1) * 2 - 1
        gy1_s = jax.nn.sigmoid(gy1) * 2 - 1
        gx2_s = jax.nn.sigmoid(gx2 * alphax) * 2 - 1
        gy2_s = jax.nn.sigmoid(gy2 * alphay) * 2 - 1
        gradx_loss.append(jnp.mean(gx1_s ** 2 * gx2_s ** 2, axis=(1, 2, 3)) ** 0.25)
        grady_loss.append(jnp.mean(gy1_s ** 2 * gy2_s ** 2, axis=(1, 2, 3)) ** 0.25)
        n, c, h, w = img1.shape
        img1 = img1.reshape(n, c, h // 2, 2, w // 2, 2).mean(axis=(3, 5))
        img2 = img2.reshape(n, c, h // 2, 2, w // 2, 2).mean(axis=(3, 5))
    return gradx_loss, grady_loss


if __name__ == "__main__":
    key = jax.random.PRNGKey(0)
    k1, k2 = jax.random.split(key)
    # small NCHW inputs consistent with the module's forward
    img1 = jax.random.normal(k1, (2, 4, 16, 16), dtype=jnp.float32)
    img2 = jax.random.normal(k2, (2, 4, 16, 16), dtype=jnp.float32)

    loss_fn = jax.jit(exclusion_loss, static_argnums=2)
    gradx_loss, grady_loss = loss_fn(img1, img2, 3)
    jax.block_until_ready(gradx_loss)
    jax.block_until_ready(grady_loss)

    # verify against pure-JAX reference
    ref_gx, ref_gy = _ref_exclusion_loss(img1, img2, level=3)
    for got, want in zip(gradx_loss + grady_loss, ref_gx + ref_gy):
        np.testing.assert_allclose(np.asarray(got), np.asarray(want),
                                   rtol=2e-3, atol=1e-4)

    print("KERNEL_OK")
</pallas_src>

<mosaic_0001>
module attributes {stable_mosaic.version = 11 : i64} {
  func.func @_exclusion_kernel(%arg0: i32, %arg1: memref<6xf32, #tpu.memory_space<smem>>, %arg2: memref<8x16x16xf32, #tpu.memory_space<vmem>>, %arg3: memref<8x8x8xf32, #tpu.memory_space<vmem>>, %arg4: memref<8x4x4xf32, #tpu.memory_space<vmem>>, %arg5: memref<8x16x16xf32, #tpu.memory_space<vmem>>, %arg6: memref<8x8x8xf32, #tpu.memory_space<vmem>>, %arg7: memref<8x4x4xf32, #tpu.memory_space<vmem>>, %arg8: memref<1x3x8xf32, #tpu.memory_space<vmem>>, %arg9: memref<1x3x8xf32, #tpu.memory_space<vmem>>) attributes {dimension_semantics = [#tpu.dimension_semantics<parallel>], iteration_bounds = array<i64: 1>, scalar_prefetch = 1 : i64, scratch_operands = 0 : i64, tpu.core_type = #tpu.core_type<tc>, window_params = [{transform_indices = @transform_0, window_bounds = array<i64: 8, 16, 16>}, {transform_indices = @transform_1, window_bounds = array<i64: 8, 8, 8>}, {transform_indices = @transform_2, window_bounds = array<i64: 8, 4, 4>}, {transform_indices = @transform_3, window_bounds = array<i64: 8, 16, 16>}, {transform_indices = @transform_4, window_bounds = array<i64: 8, 8, 8>}, {transform_indices = @transform_5, window_bounds = array<i64: 8, 4, 4>}, {transform_indices = @transform_6, window_bounds = array<i64: 1, 3, 8>}, {transform_indices = @transform_7, window_bounds = array<i64: 1, 3, 8>}]} {
    %c0 = arith.constant 0 : index
    %c0_0 = arith.constant 0 : index
    %c0_1 = arith.constant 0 : index
    %0 = vector.load %arg2[%c0, %c0_0, %c0_1] : memref<8x16x16xf32, #tpu.memory_space<vmem>>, vector<8x16x16xf32>
    %c0_2 = arith.constant 0 : index
    %c0_3 = arith.constant 0 : index
    %c0_4 = arith.constant 0 : index
    %1 = vector.load %arg5[%c0_2, %c0_3, %c0_4] : memref<8x16x16xf32, #tpu.memory_space<vmem>>, vector<8x16x16xf32>
    %c0_5 = arith.constant 0 : index
    %2 = memref.load %arg1[%c0_5] : memref<6xf32, #tpu.memory_space<smem>>
    %c1 = arith.constant 1 : index
    %3 = memref.load %arg1[%c1] : memref<6xf32, #tpu.memory_space<smem>>
    %4 = vector.extract_strided_slice %0 {offsets = [0, 1, 0], sizes = [8, 15, 16], strides = [1, 1, 1]} : vector<8x16x16xf32> to vector<8x15x16xf32>
    %5 = vector.extract_strided_slice %0 {offsets = [0, 0, 0], sizes = [8, 15, 16], strides = [1, 1, 1]} : vector<8x16x16xf32> to vector<8x15x16xf32>
    %6 = arith.subf %4, %5 : vector<8x15x16xf32>
    %7 = vector.extract_strided_slice %1 {offsets = [0, 1, 0], sizes = [8, 15, 16], strides = [1, 1, 1]} : vector<8x16x16xf32> to vector<8x15x16xf32>
    %8 = vector.extract_strided_slice %1 {offsets = [0, 0, 0], sizes = [8, 15, 16], strides = [1, 1, 1]} : vector<8x16x16xf32> to vector<8x15x16xf32>
    %9 = arith.subf %7, %8 : vector<8x15x16xf32>
    %cst = arith.constant 5.000000e-01 : f32
    %10 = vector.broadcast %cst : f32 to vector<8x15x16xf32>
    %11 = arith.mulf %10, %6 : vector<8x15x16xf32>
    %12 = math.tanh %11 : vector<8x15x16xf32>
    %cst_6 = arith.constant 5.000000e-01 : f32
    %13 = arith.mulf %cst_6, %2 : f32
    %14 = vector.broadcast %13 : f32 to vector<8x15x16xf32>
    %15 = arith.mulf %14, %9 : vector<8x15x16xf32>
    %16 = math.tanh %15 : vector<8x15x16xf32>
    %17 = arith.mulf %12, %16 : vector<8x15x16xf32>
    %18 = arith.mulf %17, %17 : vector<8x15x16xf32>
    %cst_7 = arith.constant dense<0.000000e+00> : vector<8x15xf32>
    %19 = vector.multi_reduction <add>, %18, %cst_7 [2] : vector<8x15x16xf32> to vector<8x15xf32>
    %cst_8 = arith.constant dense<0.000000e+00> : vector<8xf32>
    %20 = vector.multi_reduction <add>, %19, %cst_8 [1] : vector<8x15xf32> to vector<8xf32>
    %c0_9 = arith.constant 0 : index
    %c0_10 = arith.constant 0 : index
    %c0_11 = arith.constant 0 : index
    %21 = vector.load %arg8[%c0_9, %c0_10, %c0_11] : memref<1x3x8xf32, #tpu.memory_space<vmem>>, vector<1x1x8xf32>
    %22 = vector.shape_cast %21 : vector<1x1x8xf32> to vector<8xf32>
    %23 = vector.shape_cast %20 : vector<8xf32> to vector<1x1x8xf32>
    tpu.vector_store %arg8[%c0_9, %c0_10, %c0_11], %23 {strides = array<i32>} : memref<1x3x8xf32, #tpu.memory_space<vmem>>, vector<1x1x8xf32>,
    %24 = vector.extract_strided_slice %0 {offsets = [0, 0, 1], sizes = [8, 16, 15], strides = [1, 1, 1]} : vector<8x16x16xf32> to vector<8x16x15xf32>
    %25 = vector.extract_strided_slice %0 {offsets = [0, 0, 0], sizes = [8, 16, 15], strides = [1, 1, 1]} : vector<8x16x16xf32> to vector<8x16x15xf32>
    %26 = arith.subf %24, %25 : vector<8x16x15xf32>
    %27 = vector.extract_strided_slice %1 {offsets = [0, 0, 1], sizes = [8, 16, 15], strides = [1, 1, 1]} : vector<8x16x16xf32> to vector<8x16x15xf32>
    %28 = vector.extract_strided_slice %1 {offsets = [0, 0, 0], sizes = [8, 16, 15], strides = [1, 1, 1]} : vector<8x16x16xf32> to vector<8x16x15xf32>
    %29 = arith.subf %27, %28 : vector<8x16x15xf32>
    %cst_12 = arith.constant 5.000000e-01 : f32
    %30 = vector.broadcast %cst_12 : f32 to vector<8x16x15xf32>
    %31 = arith.mulf %30, %26 : vector<8x16x15xf32>
    %32 = math.tanh %31 : vector<8x16x15xf32>
    %cst_13 = arith.constant 5.000000e-01 : f32
    %33 = arith.mulf %cst_13, %3 : f32
    %34 = vector.broadcast %33 : f32 to vector<8x16x15xf32>
    %35 = arith.mulf %34, %29 : vector<8x16x15xf32>
    %36 = math.tanh %35 : vector<8x16x15xf32>
    %37 = arith.mulf %32, %36 : vector<8x16x15xf32>
    %38 = arith.mulf %37, %37 : vector<8x16x15xf32>
    %cst_14 = arith.constant dense<0.000000e+00> : vector<8x16xf32>
    %39 = vector.multi_reduction <add>, %38, %cst_14 [2] : vector<8x16x15xf32> to vector<8x16xf32>
    %cst_15 = arith.constant dense<0.000000e+00> : vector<8xf32>
    %40 = vector.multi_reduction <add>, %39, %cst_15 [1] : vector<8x16xf32> to vector<8xf32>
    %c0_16 = arith.constant 0 : index
    %c0_17 = arith.constant 0 : index
    %c0_18 = arith.constant 0 : index
    %41 = vector.load %arg9[%c0_16, %c0_17, %c0_18] : memref<1x3x8xf32, #tpu.memory_space<vmem>>, vector<1x1x8xf32>
    %42 = vector.shape_cast %41 : vector<1x1x8xf32> to vector<8xf32>
    %43 = vector.shape_cast %40 : vector<8xf32> to vector<1x1x8xf32>
    tpu.vector_store %arg9[%c0_16, %c0_17, %c0_18], %43 {strides = array<i32>} : memref<1x3x8xf32, #tpu.memory_space<vmem>>, vector<1x1x8xf32>,
    %c0_19 = arith.constant 0 : index
    %c0_20 = arith.constant 0 : index
    %c0_21 = arith.constant 0 : index
    %44 = vector.load %arg3[%c0_19, %c0_20, %c0_21] : memref<8x8x8xf32, #tpu.memory_space<vmem>>, vector<8x8x8xf32>
    %c0_22 = arith.constant 0 : index
    %c0_23 = arith.constant 0 : index
    %c0_24 = arith.constant 0 : index
    %45 = vector.load %arg6[%c0_22, %c0_23, %c0_24] : memref<8x8x8xf32, #tpu.memory_space<vmem>>, vector<8x8x8xf32>
    %c2 = arith.constant 2 : index
    %46 = memref.load %arg1[%c2] : memref<6xf32, #tpu.memory_space<smem>>
    %c3 = arith.constant 3 : index
    %47 = memref.load %arg1[%c3] : memref<6xf32, #tpu.memory_space<smem>>
    %48 = vector.extract_strided_slice %44 {offsets = [0, 1, 0], sizes = [8, 7, 8], strides = [1, 1, 1]} : vector<8x8x8xf32> to vector<8x7x8xf32>
    %49 = vector.extract_strided_slice %44 {offsets = [0, 0, 0], sizes = [8, 7, 8], strides = [1, 1, 1]} : vector<8x8x8xf32> to vector<8x7x8xf32>
    %50 = arith.subf %48, %49 : vector<8x7x8xf32>
    %51 = vector.extract_strided_slice %45 {offsets = [0, 1, 0], sizes = [8, 7, 8], strides = [1, 1, 1]} : vector<8x8x8xf32> to vector<8x7x8xf32>
    %52 = vector.extract_strided_slice %45 {offsets = [0, 0, 0], sizes = [8, 7, 8], strides = [1, 1, 1]} : vector<8x8x8xf32> to vector<8x7x8xf32>
    %53 = arith.subf %51, %52 : vector<8x7x8xf32>
    %cst_25 = arith.constant 5.000000e-01 : f32
    %54 = vector.broadcast %cst_25 : f32 to vector<8x7x8xf32>
    %55 = arith.mulf %54, %50 : vector<8x7x8xf32>
    %56 = math.tanh %55 : vector<8x7x8xf32>
    %cst_26 = arith.constant 5.000000e-01 : f32
    %57 = arith.mulf %cst_26, %46 : f32
    %58 = vector.broadcast %57 : f32 to vector<8x7x8xf32>
    %59 = arith.mulf %58, %53 : vector<8x7x8xf32>
    %60 = math.tanh %59 : vector<8x7x8xf32>
    %61 = arith.mulf %56, %60 : vector<8x7x8xf32>
    %62 = arith.mulf %61, %61 : vector<8x7x8xf32>
    %cst_27 = arith.constant dense<0.000000e+00> : vector<8x7xf32>
    %63 = vector.multi_reduction <add>, %62, %cst_27 [2] : vector<8x7x8xf32> to vector<8x7xf32>
    %cst_28 = arith.constant dense<0.000000e+00> : vector<8xf32>
    %64 = vector.multi_reduction <add>, %63, %cst_28 [1] : vector<8x7xf32> to vector<8xf32>
    %c0_29 = arith.constant 0 : index
    %c1_30 = arith.constant 1 : index
    %c0_31 = arith.constant 0 : index
    %65 = vector.load %arg8[%c0_29, %c1_30, %c0_31] : memref<1x3x8xf32, #tpu.memory_space<vmem>>, vector<1x1x8xf32>
    %66 = vector.shape_cast %65 : vector<1x1x8xf32> to vector<8xf32>
    %67 = vector.shape_cast %64 : vector<8xf32> to vector<1x1x8xf32>
    tpu.vector_store %arg8[%c0_29, %c1_30, %c0_31], %67 {strides = array<i32>} : memref<1x3x8xf32, #tpu.memory_space<vmem>>, vector<1x1x8xf32>,
    %68 = vector.extract_strided_slice %44 {offsets = [0, 0, 1], sizes = [8, 8, 7], strides = [1, 1, 1]} : vector<8x8x8xf32> to vector<8x8x7xf32>
    %69 = vector.extract_strided_slice %44 {offsets = [0, 0, 0], sizes = [8, 8, 7], strides = [1, 1, 1]} : vector<8x8x8xf32> to vector<8x8x7xf32>
    %70 = arith.subf %68, %69 : vector<8x8x7xf32>
    %71 = vector.extract_strided_slice %45 {offsets = [0, 0, 1], sizes = [8, 8, 7], strides = [1, 1, 1]} : vector<8x8x8xf32> to vector<8x8x7xf32>
    %72 = vector.extract_strided_slice %45 {offsets = [0, 0, 0], sizes = [8, 8, 7], strides = [1, 1, 1]} : vector<8x8x8xf32> to vector<8x8x7xf32>
    %73 = arith.subf %71, %72 : vector<8x8x7xf32>
    %cst_32 = arith.constant 5.000000e-01 : f32
    %74 = vector.broadcast %cst_32 : f32 to vector<8x8x7xf32>
    %75 = arith.mulf %74, %70 : vector<8x8x7xf32>
    %76 = math.tanh %75 : vector<8x8x7xf32>
    %cst_33 = arith.constant 5.000000e-01 : f32
    %77 = arith.mulf %cst_33, %47 : f32
    %78 = vector.broadcast %77 : f32 to vector<8x8x7xf32>
    %79 = arith.mulf %78, %73 : vector<8x8x7xf32>
    %80 = math.tanh %79 : vector<8x8x7xf32>
    %81 = arith.mulf %76, %80 : vector<8x8x7xf32>
    %82 = arith.mulf %81, %81 : vector<8x8x7xf32>
    %cst_34 = arith.constant dense<0.000000e+00> : vector<8x8xf32>
    %83 = vector.multi_reduction <add>, %82, %cst_34 [2] : vector<8x8x7xf32> to vector<8x8xf32>
    %cst_35 = arith.constant dense<0.000000e+00> : vector<8xf32>
    %84 = vector.multi_reduction <add>, %83, %cst_35 [1] : vector<8x8xf32> to vector<8xf32>
    %c0_36 = arith.constant 0 : index
    %c1_37 = arith.constant 1 : index
    %c0_38 = arith.constant 0 : index
    %85 = vector.load %arg9[%c0_36, %c1_37, %c0_38] : memref<1x3x8xf32, #tpu.memory_space<vmem>>, vector<1x1x8xf32>
    %86 = vector.shape_cast %85 : vector<1x1x8xf32> to vector<8xf32>
    %87 = vector.shape_cast %84 : vector<8xf32> to vector<1x1x8xf32>
    tpu.vector_store %arg9[%c0_36, %c1_37, %c0_38], %87 {strides = array<i32>} : memref<1x3x8xf32, #tpu.memory_space<vmem>>, vector<1x1x8xf32>,
    %c0_39 = arith.constant 0 : index
    %c0_40 = arith.constant 0 : index
    %c0_41 = arith.constant 0 : index
    %88 = vector.load %arg4[%c0_39, %c0_40, %c0_41] : memref<8x4x4xf32, #tpu.memory_space<vmem>>, vector<8x4x4xf32>
    %c0_42 = arith.constant 0 : index
    %c0_43 = arith.constant 0 : index
    %c0_44 = arith.constant 0 : index
    %89 = vector.load %arg7[%c0_42, %c0_43, %c0_44] : memref<8x4x4xf32, #tpu.memory_space<vmem>>, vector<8x4x4xf32>
    %c4 = arith.constant 4 : index
    %90 = memref.load %arg1[%c4] : memref<6xf32, #tpu.memory_space<smem>>
    %c5 = arith.constant 5 : index
    %91 = memref.load %arg1[%c5] : memref<6xf32, #tpu.memory_space<smem>>
    %92 = vector.extract_strided_slice %88 {offsets = [0, 1, 0], sizes = [8, 3, 4], strides = [1, 1, 1]} : vector<8x4x4xf32> to vector<8x3x4xf32>
    %93 = vector.extract_strided_slice %88 {offsets = [0, 0, 0], sizes = [8, 3, 4], strides = [1, 1, 1]} : vector<8x4x4xf32> to vector<8x3x4xf32>
    %94 = arith.subf %92, %93 : vector<8x3x4xf32>
    %95 = vector.extract_strided_slice %89 {offsets = [0, 1, 0], sizes = [8, 3, 4], strides = [1, 1, 1]} : vector<8x4x4xf32> to vector<8x3x4xf32>
    %96 = vector.extract_strided_slice %89 {offsets = [0, 0, 0], sizes = [8, 3, 4], strides = [1, 1, 1]} : vector<8x4x4xf32> to vector<8x3x4xf32>
    %97 = arith.subf %95, %96 : vector<8x3x4xf32>
    %cst_45 = arith.constant 5.000000e-01 : f32
    %98 = vector.broadcast %cst_45 : f32 to vector<8x3x4xf32>
    %99 = arith.mulf %98, %94 : vector<8x3x4xf32>
    %100 = math.tanh %99 : vector<8x3x4xf32>
    %cst_46 = arith.constant 5.000000e-01 : f32
    %101 = arith.mulf %cst_46, %90 : f32
    %102 = vector.broadcast %101 : f32 to vector<8x3x4xf32>
    %103 = arith.mulf %102, %97 : vector<8x3x4xf32>
    %104 = math.tanh %103 : vector<8x3x4xf32>
    %105 = arith.mulf %100, %104 : vector<8x3x4xf32>
    %106 = arith.mulf %105, %105 : vector<8x3x4xf32>
    %cst_47 = arith.constant dense<0.000000e+00> : vector<8x3xf32>
    %107 = vector.multi_reduction <add>, %106, %cst_47 [2] : vector<8x3x4xf32> to vector<8x3xf32>
    %cst_48 = arith.constant dense<0.000000e+00> : vector<8xf32>
    %108 = vector.multi_reduction <add>, %107, %cst_48 [1] : vector<8x3xf32> to vector<8xf32>
    %c0_49 = arith.constant 0 : index
    %c2_50 = arith.constant 2 : index
    %c0_51 = arith.constant 0 : index
    %109 = vector.load %arg8[%c0_49, %c2_50, %c0_51] : memref<1x3x8xf32, #tpu.memory_space<vmem>>, vector<1x1x8xf32>
    %110 = vector.shape_cast %109 : vector<1x1x8xf32> to vector<8xf32>
    %111 = vector.shape_cast %108 : vector<8xf32> to vector<1x1x8xf32>
    tpu.vector_store %arg8[%c0_49, %c2_50, %c0_51], %111 {strides = array<i32>} : memref<1x3x8xf32, #tpu.memory_space<vmem>>, vector<1x1x8xf32>,
    %112 = vector.extract_strided_slice %88 {offsets = [0, 0, 1], sizes = [8, 4, 3], strides = [1, 1, 1]} : vector<8x4x4xf32> to vector<8x4x3xf32>
    %113 = vector.extract_strided_slice %88 {offsets = [0, 0, 0], sizes = [8, 4, 3], strides = [1, 1, 1]} : vector<8x4x4xf32> to vector<8x4x3xf32>
    %114 = arith.subf %112, %113 : vector<8x4x3xf32>
    %115 = vector.extract_strided_slice %89 {offsets = [0, 0, 1], sizes = [8, 4, 3], strides = [1, 1, 1]} : vector<8x4x4xf32> to vector<8x4x3xf32>
    %116 = vector.extract_strided_slice %89 {offsets = [0, 0, 0], sizes = [8, 4, 3], strides = [1, 1, 1]} : vector<8x4x4xf32> to vector<8x4x3xf32>
    %117 = arith.subf %115, %116 : vector<8x4x3xf32>
    %cst_52 = arith.constant 5.000000e-01 : f32
    %118 = vector.broadcast %cst_52 : f32 to vector<8x4x3xf32>
    %119 = arith.mulf %118, %114 : vector<8x4x3xf32>
    %120 = math.tanh %119 : vector<8x4x3xf32>
    %cst_53 = arith.constant 5.000000e-01 : f32
    %121 = arith.mulf %cst_53, %91 : f32
    %122 = vector.broadcast %121 : f32 to vector<8x4x3xf32>
    %123 = arith.mulf %122, %117 : vector<8x4x3xf32>
    %124 = math.tanh %123 : vector<8x4x3xf32>
    %125 = arith.mulf %120, %124 : vector<8x4x3xf32>
    %126 = arith.mulf %125, %125 : vector<8x4x3xf32>
    %cst_54 = arith.constant dense<0.000000e+00> : vector<8x4xf32>
    %127 = vector.multi_reduction <add>, %126, %cst_54 [2] : vector<8x4x3xf32> to vector<8x4xf32>
    %cst_55 = arith.constant dense<0.000000e+00> : vector<8xf32>
    %128 = vector.multi_reduction <add>, %127, %cst_55 [1] : vector<8x4xf32> to vector<8xf32>
    %c0_56 = arith.constant 0 : index
    %c2_57 = arith.constant 2 : index
    %c0_58 = arith.constant 0 : index
    %129 = vector.load %arg9[%c0_56, %c2_57, %c0_58] : memref<1x3x8xf32, #tpu.memory_space<vmem>>, vector<1x1x8xf32>
    %130 = vector.shape_cast %129 : vector<1x1x8xf32> to vector<8xf32>
    %131 = vector.shape_cast %128 : vector<8xf32> to vector<1x1x8xf32>
    tpu.vector_store %arg9[%c0_56, %c2_57, %c0_58], %131 {strides = array<i32>} : memref<1x3x8xf32, #tpu.memory_space<vmem>>, vector<1x1x8xf32>,
    return
  }
  func.func @transform_0(%arg0: i32, %arg1: memref<6xf32, #tpu.memory_space<smem>>) -> (i32, i32, i32) {
    %c0_i32 = arith.constant 0 : i32
    %c0_i32_0 = arith.constant 0 : i32
    %c0_i32_1 = arith.constant 0 : i32
    return %arg0, %c0_i32, %c0_i32_0 : i32, i32, i32
  }
  func.func @transform_1(%arg0: i32, %arg1: memref<6xf32, #tpu.memory_space<smem>>) -> (i32, i32, i32) {
    %c0_i32 = arith.constant 0 : i32
    %c0_i32_0 = arith.constant 0 : i32
    %c0_i32_1 = arith.constant 0 : i32
    return %arg0, %c0_i32, %c0_i32_0 : i32, i32, i32
  }
  func.func @transform_2(%arg0: i32, %arg1: memref<6xf32, #tpu.memory_space<smem>>) -> (i32, i32, i32) {
    %c0_i32 = arith.constant 0 : i32
    %c0_i32_0 = arith.constant 0 : i32
    %c0_i32_1 = arith.constant 0 : i32
    return %arg0, %c0_i32, %c0_i32_0 : i32, i32, i32
  }
  func.func @transform_3(%arg0: i32, %arg1: memref<6xf32, #tpu.memory_space<smem>>) -> (i32, i32, i32) {
    %c0_i32 = arith.constant 0 : i32
    %c0_i32_0 = arith.constant 0 : i32
    %c0_i32_1 = arith.constant 0 : i32
    return %arg0, %c0_i32, %c0_i32_0 : i32, i32, i32
  }
  func.func @transform_4(%arg0: i32, %arg1: memref<6xf32, #tpu.memory_space<smem>>) -> (i32, i32, i32) {
    %c0_i32 = arith.constant 0 : i32
    %c0_i32_0 = arith.constant 0 : i32
    %c0_i32_1 = arith.constant 0 : i32
    return %arg0, %c0_i32, %c0_i32_0 : i32, i32, i32
  }
  func.func @transform_5(%arg0: i32, %arg1: memref<6xf32, #tpu.memory_space<smem>>) -> (i32, i32, i32) {
    %c0_i32 = arith.constant 0 : i32
    %c0_i32_0 = arith.constant 0 : i32
    %c0_i32_1 = arith.constant 0 : i32
    return %arg0, %c0_i32, %c0_i32_0 : i32, i32, i32
  }
  func.func @transform_6(%arg0: i32, %arg1: memref<6xf32, #tpu.memory_space<smem>>) -> (i32, i32, i32) {
    %c0_i32 = arith.constant 0 : i32
    %c0_i32_0 = arith.constant 0 : i32
    %c0_i32_1 = arith.constant 0 : i32
    return %arg0, %c0_i32, %c0_i32_0 : i32, i32, i32
  }
  func.func @transform_7(%arg0: i32, %arg1: memref<6xf32, #tpu.memory_space<smem>>) -> (i32, i32, i32) {
    %c0_i32 = arith.constant 0 : i32
    %c0_i32_0 = arith.constant 0 : i32
    %c0_i32_1 = arith.constant 0 : i32
    return %arg0, %c0_i32, %c0_i32_0 : i32, i32, i32
  }
}

</mosaic_0001>

<bundles_post_ra>
// kernel: squeeze.6
= control target key start
LH: loop header
LB: loop body
LE: loop exit
PB: predicated region body
PF: predicated region fallthrough
CT: control target
= control target key end

     0   :  { %vm7_vm0 = vcmask 31744   ;;  %s39_s0 = inlined_call_operand.vmem [shape: f32[8], index: 0, kind: input, shape index: {}]   ;;  %s40_s1 = inlined_call_operand.vmem [shape: f32[2,4], index: 1, kind: output, shape index: {}]  }
   0x1   :  { %v4_v0 = vld [vmem:[%s39_s0] sm:$0x1]  ;;  %s22_s0 = smov 124  }
   0x2   :  { %5 = vst [vmem:[#allocation1] sm:$0x1] %v4_v0 }
   0x9   :  { %v9_v1 = vld [vmem:[#allocation1] sm:$0x1]  }
   0xa   :  { %v6_v2 = vld [vmem:[#allocation1] sm:$0x1]   ;;  %10 = vrot.lane.b32.xlu0 %v9_v1, %s22_s0 }
   0xb   :  { %8 = vst.msk [vmem:[#allocation0] sm:$0x1] %vm7_vm0, %v6_v2  }
  0x7c   :  { %v11_v3 = vpop.permute.xlu0 %10  }
  0x7d   :  { %14 = vst.msk [vmem:[#allocation0 + $0x1] sm:$0x1] %vm7_vm0, %v11_v3  }
  0x84   :  { %v17_v4 = vld [vmem:[#allocation0] sm:$0x3] }
  0x85   :  { %20 = vst [vmem:[%s40_s1] sm:$0x3] %v17_v4 }

// kernel: exclusion_loss.1
= control target key start
LH: loop header
LB: loop body
LE: loop exit
PB: predicated region body
PF: predicated region fallthrough
CT: control target
= control target key end

     0   :  { %s1894_s30 = smov [#allocation3]   ;;  %s3064_s0 = inlined_call_operand.vmem [shape: f32[6], index: 0, kind: input, shape index: {}]   ;;  %s3065_s1 = inlined_call_operand.vmem [shape: f32[8,16,16], index: 1, kind: input, shape index: {}]   ;;  %s3066_s2 = inlined_call_operand.vmem [shape: f32[8,8,8], index: 2, kind: input, shape index: {}]   ;;  %s3067_s3 = inlined_call_operand.vmem [shape: f32[8,4,4], index: 3, kind: input, shape index: {}]   ;;  %s3068_s4 = inlined_call_operand.vmem [shape: f32[8,16,16], index: 4, kind: input, shape index: {}]   ;;  %s3069_s5 = inlined_call_operand.vmem [shape: f32[8,8,8], index: 5, kind: input, shape index: {}]   ;;  %s3070_s6 = inlined_call_operand.vmem [shape: f32[8,4,4], index: 6, kind: input, shape index: {}]   ;;  %s3071_s7 = inlined_call_operand.vmem [shape: f32[1,3,8], index: 7, kind: output, shape index: {0}]   ;;  %s3072_s8 = inlined_call_operand.vmem [shape: f32[1,3,8], index: 8, kind: output, shape index: {1}]  }
   0x1   :  { %s15_s29 = sshll.u32 %s3064_s0, 4  ;;  %s16_s29 = int_to_ptr.vmem [resolvable:$true] %s15_s29 }
   0x2   :  { %18 = dma.vmem_to_smem %s16_s29, 16, %s1894_s30, [#allocation2] }
   0x3   :  { %1892 = dma.done.wait [#allocation2], 16 }
   0x4   :  { %1893 = vsyncadd [#allocation2], 4294967280 }
   0x5   :  { %21 = sfence }
   0x6   :  { %v1948_v0 = vld [vmem:[%s3065_s1 + $0x20] sm:$0xff]  ;;  %s1955_s13 = sld [smem:[#allocation3]]  ;;  %v1960_v2 = vld [vmem:[%s3065_s1 + $0x10] sm:$0xff]  ;;  %v1986_v12 = vld [vmem:[%s3065_s1 + $0x28] sm:$0xff]  ;;  %vm84_vm0 = vcmask 1040384   ;;  %vm311_vm1 = vcmask 130049  }
   0x7   :  { %v1953_v1 = vld [vmem:[%s3068_s4 + $0x20] sm:$0xff]  ;;  %v91_v3 = vrot.slane %v1948_v0, 7  ;;  %v1967_v5 = vld [vmem:[%s3068_s4 + $0x10] sm:$0xff]  ;;  %v88_v6 = vrot.slane %v1960_v2, 7  ;;  %v1991_v13 = vld [vmem:[%s3068_s4 + $0x28] sm:$0xff]  ;;  %v92_v16 = vrot.slane %v1986_v12, 7 }
   0x8   :  { %v163_v4 = vrot.slane %v1953_v1, 7  ;;  %v1973_v7 = vld [vmem:[%s3065_s1] sm:$0xff]  ;;  %v160_v9 = vrot.slane %v1967_v5, 7  ;;  %v1999_v17 = vld [vmem:[%s3065_s1 + $0x18] sm:$0xff]  ;;  %v164_v21 = vrot.slane %v1991_v13, 7  ;;  %v2013_v23 = vld [vmem:[%s3065_s1 + $0x8] sm:$0xff] }
   0x9   :  { %v1978_v8 = vld [vmem:[%s3068_s4] sm:$0xff]  ;;  %v85_v10 = vrot.slane %v1973_v7, 7  ;;  %v129_v14 = vsub.f32 %v1948_v0, %v91_v3  ;;  %v127_v15 = vsub.f32 %v1960_v2, %v88_v6  ;;  %v2008_v22 = vld [vmem:[%s3068_s4 + $0x18] sm:$0xff]  ;;  %v93_v27 = vsel %vm84_vm0, %v91_v3, %v92_v16  ;;  %v2030_v38 = vld [vmem:[%s3068_s4 + $0x8] sm:$0xff]  ;;  %s1616_s27 = sld [smem:[#allocation3 + $0x1]]  ;;  %s1896_s29 = smov 127  }
   0xa   :  { %v157_v11 = vrot.slane %v1978_v8, 7  ;;  %v201_v18 = vsub.f32 %v1953_v1, %v163_v4  ;;  %v199_v19 = vsub.f32 %v1967_v5, %v160_v9  ;;  %v130_v29 = vsub.f32 %v1986_v12, %v93_v27  ;;  %v2038_v42 = vld [vmem:[%s3065_s1 + $0x40] sm:$0xff]  ;;  %v2056_v53 = vld [vmem:[%s3065_s1 + $0x30] sm:$0xff]  ;;  %v2061_v54 = vld [vmem:[%s3065_s1 + $0x38] sm:$0xff]  ;;  %s1617_s30 = sld [smem:[#allocation3 + $0x2]] }
   0xb   :  { %v125_v20 = vsub.f32 %v1973_v7, %v85_v10  ;;  %v217_v24 = vmul.f32 0.5, %v129_v14  ;;  %v215_v25 = vmul.f32 0.5, %v127_v15  ;;  %v165_v30 = vsel %vm84_vm0, %v163_v4, %v164_v21  ;;  %v2046_v46 = vld [vmem:[%s3068_s4 + $0x40] sm:$0xff]  ;;  %v2069_v59 = vld [vmem:[%s3068_s4 + $0x30] sm:$0xff]  ;;  %v2078_v3 = vld [vmem:[%s3068_s4 + $0x38] sm:$0xff] }
   0xc   :  { %v197_v26 = vsub.f32 %v1978_v8, %v157_v11  ;;  %s245_s9 = smul.f32 0.5, %s1955_s13  ;;  %v89_v31 = vrot.slane %v1999_v17, 7  ;;  %v202_v32 = vsub.f32 %v1991_v13, %v165_v30  ;;  %v161_v33 = vrot.slane %v2008_v22, 7 }
   0xd   :  { %v213_v28 = vmul.f32 0.5, %v125_v20  ;;  %1624 = vtanh.f32 %v217_v24  ;;  %v86_v34 = vrot.slane %v2013_v23, 7  ;;  %v218_v36 = vmul.f32 0.5, %v130_v29 }
   0xe   :  { %v2024_v35 = vstv %s245_s9  ;;  %1626 = vtanh.f32 %v215_v25  ;;  %v90_v37 = vsel %vm84_vm0, %v88_v6, %v89_v31  ;;  %v162_v45 = vsel %vm84_vm0, %v160_v9, %v161_v33 }
   0xf   :  { %v251_v39 = vmul.f32 %v2024_v35, %v201_v18  ;;  %v249_v40 = vmul.f32 %v2024_v35, %v199_v19  ;;  %1628 = vtanh.f32 %v213_v28  ;;  %v247_v41 = vmul.f32 %v2024_v35, %v197_v26  ;;  %s590_s28 = smul.f32 0.5, %s1616_s27 }
  0x10   :  { %1630 = vtanh.f32 %v218_v36  ;;  %v252_v43 = vmul.f32 %v2024_v35, %v202_v32  ;;  %v128_v44 = vsub.f32 %v1999_v17, %v90_v37  ;;  %v200_v47 = vsub.f32 %v2008_v22, %v162_v45  ;;  %v2103_v45 = vld [vmem:[%s3065_s1 + $0x58] sm:$0xff]  ;;  %s923_s13 = smul.f32 0.5, %s1617_s30  ;;  %s1619_s30 = sld [smem:[#allocation3 + $0x4]] }
  0x11   :  { %1632 = vtanh.f32 %v251_v39  ;;  %v87_v48 = vsel %vm84_vm0, %v85_v10, %v86_v34  ;;  %v158_v49 = vrot.slane %v2030_v38, 7  ;;  %v97_v52 = vrot.slane %v2038_v42, 7 }
  0x12   :  { %1634 = vtanh.f32 %v249_v40  ;;  %v216_v50 = vmul.f32 0.5, %v128_v44  ;;  %v126_v51 = vsub.f32 %v2013_v23, %v87_v48  ;;  %v250_v56 = vmul.f32 %v2024_v35, %v200_v47  ;;  %v2098_v44 = vld [vmem:[%s3065_s1 + $0x50] sm:$0xff] }
  0x13   :  { %v1625_v55 = vpop.eup %1624  ;;  %1636 = vtanh.f32 %v247_v41  ;;  %v159_v57 = vsel %vm84_vm0, %v157_v11, %v158_v49  ;;  %v169_v58 = vrot.slane %v2046_v46, 7  ;;  %vm315_vm2 = vcmask 130048  }
  0x14   :  { %v1627_v60 = vpop.eup %1626  ;;  %1638 = vtanh.f32 %v252_v43  ;;  %v198_v61 = vsub.f32 %v2030_v38, %v159_v57  ;;  %v214_v62 = vmul.f32 0.5, %v126_v51  ;;  %v133_v63 = vsub.f32 %v2038_v42, %v97_v52 }
  0x15   :  { %v1629_v4 = vpop.eup %1628  ;;  %1640 = vtanh.f32 %v216_v50  ;;  %v205_v6 = vsub.f32 %v2046_v46, %v169_v58  ;;  %v94_v9 = vrot.slane %v2056_v53, 7  ;;  %v95_v10 = vrot.slane %v2061_v54, 7 }
  0x16   :  { %v1631_v11 = vpop.eup %1630  ;;  %1642 = vtanh.f32 %v250_v56  ;;  %v248_v14 = vmul.f32 %v2024_v35, %v198_v61  ;;  %v221_v15 = vmul.f32 0.5, %v133_v63  ;;  %v166_v16 = vrot.slane %v2069_v59, 7  ;;  %v2112_v61 = vld [vmem:[%s3068_s4 + $0x50] sm:$0xff]  ;;  %s1314_s9 = smul.f32 0.5, %s1619_s30 }
  0x17   :  { %v1633_v18 = vpop.eup %1632  ;;  %1644 = vtanh.f32 %v214_v62  ;;  %v255_v19 = vmul.f32 %v2024_v35, %v205_v6  ;;  %v96_v20 = vsel %vm84_vm0, %v94_v9, %v95_v10  ;;  %v167_v21 = vrot.slane %v2078_v3, 7  ;;  %v2117_v62 = vld [vmem:[%s3068_s4 + $0x58] sm:$0xff] }
  0x18   :  { %v1635_v24 = vpop.eup %1634  ;;  %v283_v25 = vmul.f32 %v1633_v18, %v1625_v55  ;;  %1646 = vtanh.f32 %v248_v14  ;;  %v132_v26 = vsub.f32 %v2061_v54, %v96_v20  ;;  %v131_v27 = vsub.f32 %v2056_v53, %v94_v9 }
  0x19   :  { %v1637_v28 = vpop.eup %1636  ;;  %v281_v29 = vmul.f32 %v1635_v24, %v1627_v60  ;;  %1648 = vtanh.f32 %v221_v15  ;;  %v168_v30 = vsel %vm84_vm0, %v166_v16, %v167_v21  ;;  %v203_v31 = vsub.f32 %v2069_v59, %v166_v16  ;;  %v2126_v16 = vld [vmem:[%s3065_s1 + $0x48] sm:$0xff] }
  0x1a   :  { %v1639_v32 = vpop.eup %1638  ;;  %v299_v33 = vmul.f32 %v283_v25, %v283_v25  ;;  %v279_v34 = vmul.f32 %v1637_v28, %v1629_v4  ;;  %1650 = vtanh.f32 %v255_v19  ;;  %v204_v36 = vsub.f32 %v2078_v3, %v168_v30  ;;  %v2136_v28 = vld [vmem:[%s3068_s4 + $0x48] sm:$0xff] }
  0x1b   :  { %v1641_v37 = vpop.eup %1640  ;;  %v297_v39 = vmul.f32 %v281_v29, %v281_v29  ;;  %v284_v40 = vmul.f32 %v1639_v32, %v1631_v11  ;;  %v220_v41 = vmul.f32 0.5, %v132_v26  ;;  %v219_v43 = vmul.f32 0.5, %v131_v27 }
  0x1c   :  { %v1643_v47 = vpop.eup %1642  ;;  %v325_v48 = vsel %vm311_vm1, %v299_v33, 0.0  ;;  %v295_v49 = vmul.f32 %v279_v34, %v279_v34  ;;  %v254_v50 = vmul.f32 %v2024_v35, %v204_v36  ;;  %v253_v51 = vmul.f32 %v2024_v35, %v203_v31 }
  0x1d   :  { %v1645_v55 = vpop.eup %1644  ;;  %326 = vadd.xlane.f32.xlu2 %v325_v48  ;;  %v319_v56 = vsel %vm311_vm1, %v297_v39, 0.0  ;;  %v300_v57 = vmul.f32 %v284_v40, %v284_v40  ;;  %v282_v60 = vmul.f32 %v1643_v47, %v1641_v37  ;;  %1652 = vtanh.f32 %v220_v41  ;;  %v2147_v40 = vld [vmem:[%s3065_s1 + $0x70] sm:$0xff] }
  0x1e   :  { %v1647_v63 = vpop.eup %1646  ;;  %320 = vadd.xlane.f32.xlu1 %v319_v56  ;;  %v312_v4 = vsel %vm311_vm1, %v295_v49, 0.0  ;;  %1654 = vtanh.f32 %v254_v50  ;;  %v100_v6 = vrot.slane %v2098_v44, 7  ;;  %v101_v9 = vrot.slane %v2103_v45, 7 }
  0x1f   :  { %v1649_v10 = vpop.eup %1648  ;;  %313 = vadd.xlane.f32.xlu0 %v312_v4  ;;  %v328_v11 = vsel %vm315_vm2, %v300_v57, 0.0  ;;  %v298_v14 = vmul.f32 %v282_v60, %v282_v60  ;;  %v280_v15 = vmul.f32 %v1647_v63, %v1645_v55  ;;  %1656 = vtanh.f32 %v219_v43  ;;  %v2159_v57 = vld [vmem:[%s3068_s4 + $0x70] sm:$0xff] }
  0x20   :  { %v1651_v18 = vpop.eup %1650  ;;  %1658 = vtanh.f32 %v253_v51  ;;  %v102_v19 = vsel %vm84_vm0, %v100_v6, %v101_v9  ;;  %v172_v20 = vrot.slane %v2112_v61, 7  ;;  %v173_v21 = vrot.slane %v2117_v62, 7  ;;  %3077 = vst [vmem:[#allocation5_spill] sm:$0xff] %v2159_v57 }
  0x21   :  { %v322_v24 = vsel %vm315_vm2, %v298_v14, 0.0  ;;  %v296_v25 = vmul.f32 %v280_v15, %v280_v15  ;;  %v287_v26 = vmul.f32 %v1651_v18, %v1649_v10  ;;  %v136_v27 = vsub.f32 %v2103_v45, %v102_v19  ;;  %v2175_v14 = vld [vmem:[%s3065_s1 + $0x68] sm:$0xff]  ;;  %v2182_v19 = vld [vmem:[%s3068_s4 + $0x60] sm:$0xff] }
  0x22   :  { %v174_v29 = vsel %vm84_vm0, %v172_v20, %v173_v21  ;;  %v135_v30 = vsub.f32 %v2098_v44, %v100_v6  ;;  %v207_v31 = vsub.f32 %v2112_v61, %v172_v20  ;;  %v98_v32 = vrot.slane %v2126_v16, 7  ;;  %v2169_v6 = vld [vmem:[%s3065_s1 + $0x60] sm:$0xff]  ;;  %3078 = vst [vmem:[#allocation6_spill] sm:$0xff] %v2182_v19  ;;  %v2187_v20 = vld [vmem:[%s3068_s4 + $0x68] sm:$0xff] }
  0x23   :  { %v1653_v33 = vpop.eup %1652  ;;  %v316_v34 = vsel %vm315_vm2, %v296_v25, 0.0  ;;  %v303_v36 = vmul.f32 %v287_v26, %v287_v26  ;;  %v208_v37 = vsub.f32 %v2117_v62, %v174_v29  ;;  %v224_v39 = vmul.f32 0.5, %v136_v27 }
  0x24   :  { %v1655_v41 = vpop.eup %1654  ;;  %v223_v43 = vmul.f32 0.5, %v135_v30  ;;  %v257_v47 = vmul.f32 %v2024_v35, %v207_v31  ;;  %v99_v48 = vsel %vm84_vm0, %v97_v52, %v98_v32  ;;  %v170_v49 = vrot.slane %v2136_v28, 7  ;;  %v2197_v31 = vld [vmem:[%s3065_s1 + $0x78] sm:$0xff] }
  0x25   :  { %v1657_v50 = vpop.eup %1656  ;;  %329 = vadd.xlane.f32.xlu2 %v328_v11  ;;  %v337_v51 = vsel %vm311_vm1, %v303_v36, 0.0  ;;  %v286_v55 = vmul.f32 %v1655_v41, %v1653_v33  ;;  %1660 = vtanh.f32 %v224_v39  ;;  %v258_v56 = vmul.f32 %v2024_v35, %v208_v37  ;;  %3079 = vst [vmem:[#allocation7_spill] sm:$0xff] %v2197_v31 }
  0x26   :  { %v1659_v60 = vpop.eup %1658  ;;  %323 = vadd.xlane.f32.xlu1 %v322_v24  ;;  %1662 = vtanh.f32 %v223_v43  ;;  %v134_v52 = vsub.f32 %v2126_v16, %v99_v48  ;;  %v171_v63 = vsel %vm84_vm0, %v169_v58, %v170_v49  ;;  %v106_v4 = vrot.slane %v2147_v40, 7 }
  0x27   :  { %317 = vadd.xlane.f32.xlu0 %v316_v34  ;;  %v302_v9 = vmul.f32 %v286_v55, %v286_v55  ;;  %v285_v10 = vmul.f32 %v1659_v60, %v1657_v50  ;;  %1664 = vtanh.f32 %v258_v56  ;;  %v206_v11 = vsub.f32 %v2136_v28, %v171_v63 }
  0x28   :  { %1666 = vtanh.f32 %v257_v47  ;;  %v222_v58 = vmul.f32 0.5, %v134_v52  ;;  %v139_v15 = vsub.f32 %v2147_v40, %v106_v4  ;;  %v178_v18 = vrot.slane %v2159_v57, 7 }
  0x29   :  { %v334_v21 = vsel %vm315_vm2, %v302_v9, 0.0  ;;  %v301_v24 = vmul.f32 %v285_v10, %v285_v10  ;;  %v256_v25 = vmul.f32 %v2024_v35, %v206_v11  ;;  %v103_v26 = vrot.slane %v2169_v6, 7  ;;  %v2213_v9 = vld [vmem:[%s3068_s4 + $0x78] sm:$0xff]  ;;  %s1895_s4 = smov 1  }
  0x2a   :  { %1668 = vtanh.f32 %v222_v58  ;;  %v211_v27 = vsub.f32 %v2159_v57, %v178_v18  ;;  %v227_v29 = vmul.f32 0.5, %v139_v15  ;;  %v104_v30 = vrot.slane %v2175_v14, 7  ;;  %3080 = vst [vmem:[#allocation8_spill] sm:$0xff] %v2213_v9 }
  0x2b   :  { %v1661_v32 = vpop.eup %1660  ;;  %v331_v33 = vsel %vm311_vm1, %v301_v24, 0.0  ;;  %1670 = vtanh.f32 %v256_v25  ;;  %v175_v34 = vrot.slane %v2182_v19, 7  ;;  %v176_v36 = vrot.slane %v2187_v20, 7 }
  0x2c   :  { %v1663_v37 = vpop.eup %1662  ;;  %1672 = vtanh.f32 %v227_v29  ;;  %v261_v39 = vmul.f32 %v2024_v35, %v211_v27  ;;  %v105_v41 = vsel %vm84_vm0, %v103_v26, %v104_v30  ;;  %v137_v43 = vsub.f32 %v2169_v6, %v103_v26 }
  0x2d   :  { %v1665_v47 = vpop.eup %1664  ;;  %338 = vadd.xlane.f32.xlu2 %v337_v51  ;;  %v138_v48 = vsub.f32 %v2175_v14, %v105_v41  ;;  %v177_v49 = vsel %vm84_vm0, %v175_v34, %v176_v36  ;;  %v209_v50 = vsub.f32 %v2182_v19, %v175_v34  ;;  %v107_v55 = vrot.slane %v2197_v31, 7 }
  0x2e   :  { %v1667_v56 = vpop.eup %1666  ;;  %335 = vadd.xlane.f32.xlu1 %v334_v21  ;;  %v290_v60 = vmul.f32 %v1665_v47, %v1661_v32  ;;  %1674 = vtanh.f32 %v261_v39  ;;  %v210_v52 = vsub.f32 %v2187_v20, %v177_v49  ;;  %v225_v63 = vmul.f32 0.5, %v137_v43 }
  0x2f   :  { %332 = vadd.xlane.f32.xlu0 %v331_v33  ;;  %v289_v51 = vmul.f32 %v1667_v56, %v1663_v37  ;;  %v226_v10 = vmul.f32 0.5, %v138_v48  ;;  %v259_v11 = vmul.f32 %v2024_v35, %v209_v50  ;;  %v108_v58 = vsel %vm84_vm0, %v106_v4, %v107_v55 }
  0x30   :  { %v1669_v15 = vpop.eup %1668  ;;  %v306_v24 = vmul.f32 %v290_v60, %v290_v60  ;;  %v260_v21 = vmul.f32 %v2024_v35, %v210_v52  ;;  %1676 = vtanh.f32 %v225_v63  ;;  %v140_v25 = vsub.f32 %v2197_v31, %v108_v58 }
  0x31   :  { %v1671_v26 = vpop.eup %1670  ;;  %v305_v27 = vmul.f32 %v289_v51, %v289_v51  ;;  %1678 = vtanh.f32 %v226_v10  ;;  %v179_v29 = vrot.slane %v2213_v9, 7  ;;  %vm383_vm3 = vcmask 121912  }
  0x32   :  { %v1673_v30 = vpop.eup %1672  ;;  %v346_v32 = vsel %vm315_vm2, %v306_v24, 0.0  ;;  %v288_v33 = vmul.f32 %v1671_v26, %v1669_v15  ;;  %1680 = vtanh.f32 %v260_v21  ;;  %v228_v34 = vmul.f32 0.5, %v140_v25 }
  0x33   :  { %v343_v4 = vsel %vm311_vm1, %v305_v27, 0.0  ;;  %1682 = vtanh.f32 %v259_v11  ;;  %v180_v36 = vsel %vm84_vm0, %v178_v18, %v179_v29  ;;  %vm406_vm4 = vcmask 1041409  }
  0x34   :  { %v1675_v37 = vpop.eup %1674  ;;  %v304_v39 = vmul.f32 %v288_v33, %v288_v33  ;;  %v212_v41 = vsub.f32 %v2213_v9, %v180_v36  ;;  %1684 = vtanh.f32 %v228_v34  ;;  %vm408_vm5 = vcmask 1042434  }
  0x35   :  { %347 = vadd.xlane.f32.xlu2 %v346_v32  ;;  %v293_v43 = vmul.f32 %v1675_v37, %v1673_v30  ;;  %vm410_vm6 = vcmask 1043459   ;;  %vm412_vm7 = vcmask 1044484   ;;  %vm414_vm8 = vcmask 1045509  }
  0x36   :  { %v1677_v47 = vpop.eup %1676  ;;  %344 = vadd.xlane.f32.xlu1 %v343_v4  ;;  %v340_v48 = vsel %vm315_vm2, %v304_v39, 0.0  ;;  %v262_v49 = vmul.f32 %v2024_v35, %v212_v41  ;;  %vm416_vm9 = vcmask 1046534   ;;  %vm418_vm10 = vcmask 1047559  }
  0x37   :  { %v1679_v50 = vpop.eup %1678  ;;  %341 = vadd.xlane.f32.xlu0 %v340_v48  ;;  %v309_v55 = vmul.f32 %v293_v43, %v293_v43  ;;  %vm421_vm11 = vcmask 121856   ;;  %vm428_vm12 = vcmask 57344   ;;  %vm957_vm13 = vcmask 64513  }
  0x38   :  { %v1681_v56 = vpop.eup %1680  ;;  %1686 = vtanh.f32 %v262_v49  ;;  %vm787_vm14 = vcmask 130112   ;;  %vm1006_vm15 = vcmask 56320   ;;  %vm1348_vm0 = vcmask 27649  }
  0x39   :  { %v1683_v60 = vpop.eup %1682  ;;  %v292_v18 = vmul.f32 %v1681_v56, %v1679_v50  ;;  %v355_v52 = vsel %vm311_vm1, %v309_v55, 0.0 }
  0x3a   :  { %v291_v63 = vmul.f32 %v1683_v60, %v1677_v47  ;;  %v1685_v10 = vpop.eup %1684 }
  0x3b   :  { %v308_v51 = vmul.f32 %v292_v18, %v292_v18 }
  0x3c   :  { %v307_v11 = vmul.f32 %v291_v63, %v291_v63 }
  0x3d   :  { %356 = vadd.xlane.f32.xlu2 %v355_v52  ;;  %v352_v58 = vsel %vm315_vm2, %v308_v51, 0.0 }
  0x3e   :  { %v1687_v15 = vpop.eup %1686  ;;  %353 = vadd.xlane.f32.xlu1 %v352_v58  ;;  %v349_v35 = vsel %vm311_vm1, %v307_v11, 0.0  ;;  %vm1551_vm1 = vcmask 19456  }
  0x3f   :  { %350 = vadd.xlane.f32.xlu0 %v349_v35  ;;  %v294_v24 = vmul.f32 %v1687_v15, %v1685_v10 }
  0x41   :  { %v310_v21 = vmul.f32 %v294_v24, %v294_v24 }
  0x43   :  { %v358_v25 = vsel %vm315_vm2, %v310_v21, 0.0 }
  0x47   :  { %359 = vadd.xlane.f32.xlu0 %v358_v25 }
  0x55   :  { %430 = vrot.lane.b32.xlu2 %v1973_v7, %s1895_s4 }
  0x57   :  { %434 = vrot.lane.b32.xlu1 %v1960_v2, %s1895_s4 }
  0x5b   :  { %432 = vrot.lane.b32.xlu0 %v2013_v23, %s1895_s4 }
  0x5d   :  { %436 = vrot.lane.b32.xlu2 %v1999_v17, %s1895_s4 }
  0x5f   :  { %442 = vrot.lane.b32.xlu1 %v2056_v53, %s1895_s4 }
  0x63   :  { %438 = vrot.lane.b32.xlu0 %v1948_v0, %s1895_s4 }
  0x65   :  { %440 = vrot.lane.b32.xlu2 %v1986_v12, %s1895_s4 }
  0x67   :  { %448 = vrot.lane.b32.xlu1 %v2126_v16, %s1895_s4 }
  0x6b   :  { %444 = vrot.lane.b32.xlu0 %v2061_v54, %s1895_s4 }
  0x6d   :  { %446 = vrot.lane.b32.xlu2 %v2038_v42, %s1895_s4 }
  0x6f   :  { %454 = vrot.lane.b32.xlu1 %v2169_v6, %s1895_s4 }
  0x73   :  { %450 = vrot.lane.b32.xlu0 %v2098_v44, %s1895_s4 }
  0x75   :  { %452 = vrot.lane.b32.xlu2 %v2103_v45, %s1895_s4 }
  0x77   :  { %460 = vrot.lane.b32.xlu1 %v2197_v31, %s1895_s4 }
  0x7b   :  { %456 = vrot.lane.b32.xlu0 %v2175_v14, %s1895_s4 }
  0x7d   :  { %458 = vrot.lane.b32.xlu2 %v2147_v40, %s1895_s4 }
  0x7f   :  { %498 = vrot.lane.b32.xlu1 %v1967_v5, %s1895_s4 }
  0x83   :  { %494 = vrot.lane.b32.xlu0 %v1978_v8, %s1895_s4 }
  0x85   :  { %496 = vrot.lane.b32.xlu2 %v2030_v38, %s1895_s4 }
  0x87   :  { %504 = vrot.lane.b32.xlu1 %v1991_v13, %s1895_s4 }
  0x8b   :  { %500 = vrot.lane.b32.xlu0 %v2008_v22, %s1895_s4 }
  0x8d   :  { %502 = vrot.lane.b32.xlu2 %v1953_v1, %s1895_s4 }
  0x8f   :  { %510 = vrot.lane.b32.xlu1 %v2046_v46, %s1895_s4 }
  0x90   :  { %v2276_v26 = vpop.xlane.xlu2 %326 }
  0x91   :  { %v2288_v30 = vpop.xlane.xlu1 %320 }
  0x92   :  { %v2278_v27 = vpop.xlane.xlu0 %313 }
  0x93   :  { %506 = vrot.lane.b32.xlu0 %v2069_v59, %s1895_s4 }
  0x95   :  { %508 = vrot.lane.b32.xlu2 %v2078_v3, %s1895_s4 }
  0x97   :  { %516 = vrot.lane.b32.xlu1 %v2117_v62, %s1895_s4 }
  0x98   :  { %v2286_v29 = vpop.xlane.xlu2 %329 }
  0x99   :  { %v2300_v34 = vpop.xlane.xlu1 %323 }
  0x9a   :  { %v2292_v32 = vpop.xlane.xlu0 %317 }
  0x9b   :  { %512 = vrot.lane.b32.xlu0 %v2136_v28, %s1895_s4 }
  0x9d   :  { %514 = vrot.lane.b32.xlu2 %v2112_v61, %s1895_s4 }
  0x9f   :  { %522 = vrot.lane.b32.xlu1 %v2159_v57, %s1895_s4 }
  0xa0   :  { %v2298_v33 = vpop.xlane.xlu2 %338 }
  0xa1   :  { %3081 = vst [vmem:[#allocation9_spill] sm:$0xff] %v2298_v33  ;;  %v2312_v37 = vpop.xlane.xlu1 %335 }
  0xa2   :  { %v2306_v4 = vpop.xlane.xlu0 %332 }
  0xa3   :  { %518 = vrot.lane.b32.xlu0 %v2182_v19, %s1895_s4 }
  0xa5   :  { %520 = vrot.lane.b32.xlu2 %v2187_v20, %s1895_s4 }
  0xa8   :  { %v2308_v36 = vpop.xlane.xlu2 %347 }
  0xa9   :  { %3082 = vst [vmem:[#allocation10_spill] sm:$0xff] %v2308_v36  ;;  %v2318_v43 = vpop.xlane.xlu1 %344 }
  0xaa   :  { %v2316_v41 = vpop.xlane.xlu0 %341  ;;  %3084 = vst [vmem:[#allocation12_spill] sm:$0xff] %v2318_v43 }
  0xab   :  { %524 = vrot.lane.b32.xlu0 %v2213_v9, %s1895_s4  ;;  %v2343_v9 = vstv %s590_s28 }
  0xb0   :  { %v2314_v39 = vpop.xlane.xlu2 %356 }
  0xb1   :  { %3083 = vst [vmem:[#allocation11_spill] sm:$0xff] %v2314_v39  ;;  %v2324_v50 = vpop.xlane.xlu1 %353 }
  0xb2   :  { %v2320_v48 = vpop.xlane.xlu0 %350  ;;  %3086 = vst [vmem:[#allocation14_spill] sm:$0xff] %v2324_v50 }
  0xb3   :  { %3085 = vst [vmem:[#allocation13_spill] sm:$0xff] %v2320_v48 }
  0xb8   :  { %v431_v47 = vpop.permute.xlu2 %430 }
  0xb9   :  { %v478_v33 = vsub.f32 %v1973_v7, %v431_v47 }
  0xba   :  { %v2326_v55 = vpop.xlane.xlu0 %359 }
  0xbb   :  { %3087 = vst [vmem:[#allocation15_spill] sm:$0xff] %v2326_v55 }
  0xc0   :  { %v2322_v49 = vpop.permute.xlu2 %436 }
  0xc8   :  { %v441_v56 = vpop.permute.xlu2 %440 }
  0xc9   :  { %v435_v60 = vpop.permute.xlu1 %434 }
  0xca   :  { %v480_v50 = vsub.f32 %v1960_v2, %v435_v60 }
  0xcc   :  { %v560_v43 = vmul.f32 0.5, %v480_v50 }
  0xcd   :  { %v433_v18 = vpop.permute.xlu0 %432 }
  0xce   :  { %v479_v24 = vsub.f32 %v2013_v23, %v433_v18 }
  0xd0   :  { %v2328_v52 = vpop.permute.xlu2 %446  ;;  %v559_v25 = vmul.f32 0.5, %v479_v24 }
  0xd1   :  { %v2330_v63 = vpop.permute.xlu1 %442 }
  0xd2   :  { %1688 = vtanh.f32 %v559_v25 }
  0xd5   :  { %v439_v51 = vpop.permute.xlu0 %438 }
  0xd6   :  { %v482_v19 = vsub.f32 %v1948_v0, %v439_v51  ;;  %v377_v51 = vlaneseq }
  0xd8   :  { %v2332_v10 = vpop.permute.xlu2 %452  ;;  %v562_v18 = vmul.f32 0.5, %v482_v19  ;;  %v1689_v36 = vpop.eup %1688 }
  0xd9   :  { %v2334_v11 = vpop.permute.xlu1 %448 }
  0xdd   :  { %v445_v58 = vpop.permute.xlu0 %444 }
  0xde   :  { %v485_v0 = vsub.f32 %v2061_v54, %v445_v58 }
  0xe0   :  { %v2336_v15 = vpop.permute.xlu2 %458 }
  0xe1   :  { %v2338_v35 = vpop.permute.xlu1 %454 }
  0xe5   :  { %v2341_v21 = vpop.permute.xlu0 %450 }
  0xe6   :  { %v488_v58 = vsub.f32 %v2098_v44, %v2341_v21 }
  0xe8   :  { %v497_v31 = vpop.permute.xlu2 %496  ;;  %v568_v44 = vmul.f32 0.5, %v488_v58 }
  0xe9   :  { %v2345_v39 = vpop.permute.xlu1 %460  ;;  %v543_v55 = vsub.f32 %v2030_v38, %v497_v31 }
  0xea   :  { %3088 = vst [vmem:[#allocation16_spill] sm:$0xff] %v2345_v39 }
  0xeb   :  { %v593_v48 = vmul.f32 %v2343_v9, %v543_v55  ;;  %v558_v55 = vmul.f32 0.5, %v478_v33 }
  0xed   :  { %1690 = vtanh.f32 %v593_v48  ;;  %v2351_v23 = vpop.permute.xlu0 %456  ;;  %v483_v48 = vsub.f32 %v1986_v12, %v441_v56  ;;  %v481_v12 = vsub.f32 %v1999_v17, %v2322_v49  ;;  %v486_v17 = vsub.f32 %v2038_v42, %v2328_v52 }
  0xee   :  { %1692 = vtanh.f32 %v562_v18 }
  0xef   :  { %1694 = vtanh.f32 %v560_v43 }
  0xf0   :  { %v503_v24 = vpop.permute.xlu2 %502 }
  0xf1   :  { %v499_v57 = vpop.permute.xlu1 %498  ;;  %v546_v39 = vsub.f32 %v1953_v1, %v503_v24  ;;  %v561_v24 = vmul.f32 0.5, %v481_v12 }
  0xf2   :  { %v544_v38 = vsub.f32 %v1967_v5, %v499_v57  ;;  %v565_v5 = vmul.f32 0.5, %v485_v0  ;;  %v563_v57 = vmul.f32 0.5, %v483_v48  ;;  %v2376_v48 = vand.u32 127, %v377_v51 }
  0xf3   :  { %v1691_v31 = vpop.eup %1690  ;;  %v596_v2 = vmul.f32 %v2343_v9, %v546_v39 }
  0xf4   :  { %v594_v19 = vmul.f32 %v2343_v9, %v544_v38  ;;  %v625_v50 = vmul.f32 %v1691_v31, %v1689_v36  ;;  %v1693_v39 = vpop.eup %1692 }
  0xf5   :  { %v495_v60 = vpop.permute.xlu0 %494  ;;  %1696 = vtanh.f32 %v596_v2  ;;  %v1695_v43 = vpop.eup %1694 }
  0xf6   :  { %1698 = vtanh.f32 %v594_v19  ;;  %v542_v1 = vsub.f32 %v1978_v8, %v495_v60  ;;  %v641_v7 = vmul.f32 %v625_v50, %v625_v50  ;;  %v566_v19 = vmul.f32 0.5, %v486_v17 }
  0xf7   :  { %1700 = vtanh.f32 %v558_v55  ;;  %v484_v55 = vsub.f32 %v2056_v53, %v2330_v63 }
  0xf8   :  { %v592_v47 = vmul.f32 %v2343_v9, %v542_v1  ;;  %674 = vrot.lane.b32.xlu1 %v641_v7, %s1896_s29  ;;  %v509_v54 = vpop.permute.xlu2 %508 }
  0xf9   :  { %v505_v33 = vpop.permute.xlu1 %504  ;;  %v549_v36 = vsub.f32 %v2078_v3, %v509_v54  ;;  %v491_v54 = vsub.f32 %v2175_v14, %v2351_v23 }
  0xfa   :  { %1702 = vtanh.f32 %v592_v47  ;;  %v547_v8 = vsub.f32 %v1991_v13, %v505_v33 }
  0xfb   :  { %v1697_v56 = vpop.eup %1696  ;;  %1704 = vtanh.f32 %v565_v5  ;;  %v599_v25 = vmul.f32 %v2343_v9, %v549_v36  ;;  %v2384_v5 = vadd.s32 4294967289, %v2376_v48  ;;  %v2396_v36 = vadd.s32 1, %v2376_v48 }
  0xfc   :  { %v1699_v18 = vpop.eup %1698  ;;  %1706 = vtanh.f32 %v563_v57  ;;  %v597_v49 = vmul.f32 %v2343_v9, %v547_v8  ;;  %v2373_v3 = vmul.f32 %v1697_v56, %v1693_v39  ;;  %v571_v56 = vmul.f32 0.5, %v491_v54 }
  0xfd   :  { %v501_v38 = vpop.permute.xlu0 %500  ;;  %v626_v13 = vmul.f32 %v1699_v18, %v1695_v43  ;;  %1708 = vtanh.f32 %v599_v25  ;;  %v1701_v0 = vpop.eup %1700  ;;  %v380_v25 = vperm.slane %v2278_v27, %v2396_v36  ;;  %v382_v18 = vperm.slane %v2292_v32, %v2384_v5 }
  0xfe   :  { %1710 = vtanh.f32 %v597_v49  ;;  %v545_v31 = vsub.f32 %v2008_v22, %v501_v38  ;;  %v389_v27 = vperm.slane %v2286_v29, %v2384_v5 }
  0xff   :  { %v642_v21 = vmul.f32 %v626_v13, %v626_v13  ;;  %1712 = vtanh.f32 %v561_v24 }
 0x100   :  { %v1703_v2 = vpop.eup %1702  ;;  %v595_v42 = vmul.f32 %v2343_v9, %v545_v31  ;;  %v515_v52 = vpop.permute.xlu2 %514 }
 0x101   :  { %v1705_v50 = vpop.eup %1704  ;;  %v511_v60 = vpop.permute.xlu1 %510  ;;  %676 = vrot.lane.b32.xlu0 %v642_v21, %s1896_s29  ;;  %v624_v1 = vmul.f32 %v1703_v2, %v1701_v0  ;;  %v552_v22 = vsub.f32 %v2112_v61, %v515_v52  ;;  %v489_v61 = vsub.f32 %v2103_v45, %v2332_v10  ;;  %v385_v45 = vperm.slane %v2288_v30, %v2396_v36 }
 0x102   :  { %v1707_v7 = vpop.eup %1706  ;;  %1714 = vtanh.f32 %v595_v42  ;;  %v550_v57 = vsub.f32 %v2046_v46, %v511_v60  ;;  %v564_v46 = vmul.f32 0.5, %v484_v55  ;;  %v386_v10 = vperm.slane %v2300_v34, %v2384_v5 }
 0x103   :  { %v1709_v47 = vpop.eup %1708  ;;  %1716 = vtanh.f32 %v568_v44  ;;  %v640_v39 = vmul.f32 %v624_v1, %v624_v1  ;;  %v602_v53 = vmul.f32 %v2343_v9, %v552_v22  ;;  %v569_v17 = vmul.f32 0.5, %v489_v61 }
 0x104   :  { %v1711_v63 = vpop.eup %1710  ;;  %1718 = vtanh.f32 %v566_v19  ;;  %v600_v12 = vmul.f32 %v2343_v9, %v550_v57  ;;  %v2393_v33 = vmul.f32 %v1709_v47, %v1705_v50  ;;  %v487_v30 = vsub.f32 %v2126_v16, %v2334_v11 }
 0x105   :  { %672 = vrot.lane.b32.xlu2 %v640_v39, %s1896_s29  ;;  %v507_v43 = vpop.permute.xlu0 %506  ;;  %v629_v14 = vmul.f32 %v1711_v63, %v1707_v7  ;;  %1720 = vtanh.f32 %v602_v53  ;;  %v1713_v8 = vpop.eup %1712  ;;  %v387_v44 = vsel %vm383_vm3, %v386_v10, %v385_v45  ;;  %v384_v2 = vsel %vm383_vm3, %v382_v18, %v380_v25  ;;  %v3089_v63 = vld [vmem:[#allocation5_spill] sm:$0xff]  ;;  %v3092_v45 = vld [vmem:[#allocation12_spill] sm:$0xff] }
 0x106   :  { %1722 = vtanh.f32 %v600_v12  ;;  %v548_v23 = vsub.f32 %v2069_v59, %v507_v43  ;;  %v567_v29 = vmul.f32 0.5, %v487_v30  ;;  %v492_v42 = vsub.f32 %v2147_v40, %v2336_v15 }
 0x107   :  { %v645_v51 = vmul.f32 %v629_v14, %v629_v14  ;;  %1724 = vtanh.f32 %v564_v46  ;;  %v388_v50 = vperm.slane %v2276_v26, %v2396_v36  ;;  %v392_v1 = vperm.slane %v2312_v37, %v2384_v5 }
 0x108   :  { %v1715_v58 = vpop.eup %1714  ;;  %v598_v49 = vmul.f32 %v2343_v9, %v548_v23  ;;  %v521_v59 = vpop.permute.xlu2 %520  ;;  %v391_v22 = vperm.slane %v2306_v4, %v2396_v36  ;;  %v407_v57 = vsel %vm406_vm4, %v387_v44, %v384_v2  ;;  %v395_v26 = vperm.slane %v2316_v41, %v2384_v5  ;;  %v3090_v41 = vld [vmem:[#allocation9_spill] sm:$0xff]  ;;  %v3091_v23 = vld [vmem:[#allocation10_spill] sm:$0xff]  ;;  %v3097_v2 = vld [vmem:[#allocation11_spill] sm:$0xff] }
 0x109   :  { %v1717_v24 = vpop.eup %1716  ;;  %v517_v38 = vpop.permute.xlu1 %516  ;;  %682 = vrot.lane.b32.xlu0 %v645_v51, %s1896_s29  ;;  %v627_v34 = vmul.f32 %v1715_v58, %v1713_v8  ;;  %v555_v13 = vsub.f32 %v2187_v20, %v521_v59  ;;  %v390_v7 = vsel %vm383_vm3, %v389_v27, %v388_v50  ;;  %v490_v37 = vsub.f32 %v2169_v6, %v2338_v35  ;;  %v3096_v27 = vld [vmem:[#allocation15_spill] sm:$0xff] }
 0x10a   :  { %v1719_v31 = vpop.eup %1718  ;;  %1726 = vtanh.f32 %v598_v49  ;;  %v553_v32 = vsub.f32 %v2117_v62, %v517_v38  ;;  %v572_v54 = vmul.f32 0.5, %v492_v42  ;;  %v394_v46 = vperm.slane %v3090_v41, %v2396_v36  ;;  %v3093_v49 = vld [vmem:[#allocation14_spill] sm:$0xff]  ;;  %v3099_v42 = vld [vmem:[#allocation7_spill] sm:$0xff] }
 0x10b   :  { %v1721_v0 = vpop.eup %1720  ;;  %1728 = vtanh.f32 %v571_v56  ;;  %v643_v21 = vmul.f32 %v627_v34, %v627_v34  ;;  %v605_v16 = vmul.f32 %v2343_v9, %v555_v13  ;;  %v409_v43 = vsel %vm408_vm5, %v390_v7, %v407_v57  ;;  %v3095_v38 = vld [vmem:[#allocation6_spill] sm:$0xff] }
 0x10c   :  { %v1723_v11 = vpop.eup %1722  ;;  %1730 = vtanh.f32 %v569_v17  ;;  %v603_v20 = vmul.f32 %v2343_v9, %v553_v32  ;;  %v2420_v19 = vmul.f32 %v1721_v0, %v1717_v24  ;;  %v393_v14 = vsel %vm383_vm3, %v392_v1, %v391_v22  ;;  %v3094_v24 = vld [vmem:[#allocation13_spill] sm:$0xff] }
 0x10d   :  { %678 = vrot.lane.b32.xlu2 %v643_v21, %s1896_s29  ;;  %v513_v62 = vpop.permute.xlu0 %512  ;;  %v632_v52 = vmul.f32 %v1723_v11, %v1719_v31  ;;  %1732 = vtanh.f32 %v605_v16  ;;  %v1725_v60 = vpop.eup %1724  ;;  %v398_v8 = vperm.slane %v3091_v23, %v2384_v5  ;;  %v397_v10 = vperm.slane %v3092_v45, %v2396_v36 }
 0x10e   :  { %1734 = vtanh.f32 %v603_v20  ;;  %v551_v55 = vsub.f32 %v2136_v28, %v513_v62  ;;  %v396_v58 = vsel %vm383_vm3, %v395_v26, %v394_v46  ;;  %v570_v25 = vmul.f32 0.5, %v490_v37  ;;  %v3100_v26 = vld [vmem:[#allocation8_spill] sm:$0xff] }
 0x10f   :  { %v648_v40 = vmul.f32 %v632_v52, %v632_v52  ;;  %1736 = vtanh.f32 %v567_v29  ;;  %v401_v59 = vperm.slane %v3093_v49, %v2384_v5  ;;  %v400_v30 = vperm.slane %v3094_v24, %v2396_v36  ;;  %v3098_v29 = vld [vmem:[#allocation16_spill] sm:$0xff] }
 0x110   :  { %v1727_v15 = vpop.eup %1726  ;;  %v601_v47 = vmul.f32 %v2343_v9, %v551_v55  ;;  %v411_v31 = vsel %vm410_vm6, %v393_v14, %v409_v43  ;;  %v404_v32 = vperm.slane %v3096_v27, %v2384_v5  ;;  %v399_v21 = vsel %vm383_vm3, %v398_v8, %v397_v10 }
 0x111   :  { %v1729_v28 = vpop.eup %1728  ;;  %v523_v39 = vpop.permute.xlu1 %522  ;;  %688 = vrot.lane.b32.xlu0 %v648_v40, %s1896_s29  ;;  %v630_v4 = vmul.f32 %v1727_v15, %v1725_v60  ;;  %v413_v11 = vsel %vm412_vm7, %v396_v58, %v411_v31  ;;  %v403_v20 = vperm.slane %v3097_v2, %v2396_v36  ;;  %v493_v62 = vsub.f32 %v3099_v42, %v3098_v29  ;;  %v2529_v2 = vld [vmem:[%s3069_s5] sm:$0xff] }
 0x112   :  { %v1731_v53 = vpop.eup %1730  ;;  %1738 = vtanh.f32 %v601_v47  ;;  %v556_v61 = vsub.f32 %v3089_v63, %v523_v39  ;;  %v402_v5 = vsel %vm383_vm3, %v401_v59, %v400_v30  ;;  %v415_v22 = vsel %vm414_vm8, %v399_v21, %v413_v11  ;;  %v2518_v21 = vld [vmem:[%s3066_s2] sm:$0xff] }
 0x113   :  { %v1733_v12 = vpop.eup %1732  ;;  %v646_v6 = vmul.f32 %v630_v4, %v630_v4  ;;  %1740 = vtanh.f32 %v572_v54  ;;  %v405_v60 = vsel %vm383_vm3, %v404_v32, %v403_v20  ;;  %v573_v40 = vmul.f32 0.5, %v493_v62 }
 0x114   :  { %v1735_v35 = vpop.eup %1734  ;;  %v606_v56 = vmul.f32 %v2343_v9, %v556_v61  ;;  %v2450_v51 = vmul.f32 %v1733_v12, %v1729_v28  ;;  %v417_v57 = vsel %vm416_vm9, %v402_v5, %v415_v22  ;;  %v647_v14 = vmul.f32 %v2393_v33, %v2393_v33 }
 0x115   :  { %684 = vrot.lane.b32.xlu2 %v646_v6, %s1896_s29  ;;  %v519_v18 = vpop.permute.xlu0 %518  ;;  %v635_v17 = vmul.f32 %v1735_v35, %v1731_v53  ;;  %v1737_v13 = vpop.eup %1736  ;;  %v419_v28 = vsel %vm418_vm10, %v405_v60, %v417_v57  ;;  %v650_v6 = vmul.f32 %v2420_v19, %v2420_v19  ;;  %v851_v20 = vrot.slane %v2518_v21, 7 }
 0x116   :  { %1742 = vtanh.f32 %v606_v56  ;;  %v554_v34 = vsub.f32 %v3095_v38, %v519_v18  ;;  %v422_v53 = vsel %vm421_vm11, %v419_v28, 0.0  ;;  %v653_v35 = vmul.f32 %v2450_v51, %v2450_v51  ;;  %v2562_v28 = vld [vmem:[%s3069_s5 + $0x20] sm:$0xff] }
 0x117   :  { %v651_v0 = vmul.f32 %v635_v17, %v635_v17  ;;  %1744 = vtanh.f32 %v570_v25  ;;  %v883_v29 = vrot.slane %v2529_v2, 7  ;;  %v2536_v5 = vstv %s923_s13 }
 0x118   :  { %v1739_v44 = vpop.eup %1738  ;;  %v604_v16 = vmul.f32 %v2343_v9, %v554_v34  ;;  %vm1600_vm3 = vcmask 31744  }
 0x119   :  { %694 = vrot.lane.b32.xlu0 %v651_v0, %s1896_s29  ;;  %v633_v52 = vmul.f32 %v1739_v44, %v1737_v13  ;;  %v1741_v50 = vpop.eup %1740  ;;  %v2508_v0 = vld [vmem:[%s3066_s2 + $0x8] sm:$0xff] }
 0x11a   :  { %1746 = vtanh.f32 %v604_v16  ;;  %v2513_v44 = vld [vmem:[%s3069_s5 + $0x8] sm:$0xff]  ;;  %v852_v16 = vrot.slane %v2508_v0, 7 }
 0x11b   :  { %v649_v55 = vmul.f32 %v633_v52, %v633_v52  ;;  %1748 = vtanh.f32 %v573_v40  ;;  %v884_v11 = vrot.slane %v2513_v44, 7  ;;  %v867_v52 = vsub.f32 %v2518_v21, %v851_v20 }
 0x11c   :  { %v1743_v1 = vpop.eup %1742  ;;  %v868_v42 = vsub.f32 %v2508_v0, %v852_v16 }
 0x11d   :  { %690 = vrot.lane.b32.xlu2 %v649_v55, %s1896_s29  ;;  %v525_v15 = vpop.permute.xlu0 %524  ;;  %v638_v7 = vmul.f32 %v1743_v1, %v1741_v50  ;;  %v1745_v37 = vpop.eup %1744  ;;  %v900_v62 = vsub.f32 %v2513_v44, %v884_v11  ;;  %v899_v50 = vsub.f32 %v2529_v2, %v883_v29  ;;  %v907_v22 = vmul.f32 0.5, %v867_v52 }
 0x11e   :  { %v557_v47 = vsub.f32 %v3100_v26, %v525_v15  ;;  %v908_v60 = vmul.f32 0.5, %v868_v42  ;;  %v2545_v15 = vld [vmem:[%s3066_s2 + $0x18] sm:$0xff] }
 0x11f   :  { %v654_v54 = vmul.f32 %v638_v7, %v638_v7  ;;  %v926_v1 = vmul.f32 %v2536_v5, %v900_v62  ;;  %v925_v40 = vmul.f32 %v2536_v5, %v899_v50  ;;  %v2550_v7 = vld [vmem:[%s3069_s5 + $0x18] sm:$0xff]  ;;  %v854_v57 = vrot.slane %v2545_v15, 7 }
 0x120   :  { %v1747_v39 = vpop.eup %1746  ;;  %v607_v4 = vmul.f32 %v2343_v9, %v557_v47  ;;  %v644_v9 = vmul.f32 %v2373_v3, %v2373_v3  ;;  %v886_v26 = vrot.slane %v2550_v7, 7  ;;  %v2557_v47 = vld [vmem:[%s3066_s2 + $0x20] sm:$0xff] }
 0x121   :  { %700 = vrot.lane.b32.xlu0 %v654_v54, %s1896_s29  ;;  %v636_v63 = vmul.f32 %v1747_v39, %v1745_v37  ;;  %v1749_v12 = vpop.eup %1748  ;;  %v855_v54 = vrot.slane %v2557_v47, 7  ;;  %v870_v39 = vsub.f32 %v2545_v15, %v854_v57 }
 0x122   :  { %1750 = vtanh.f32 %v607_v4  ;;  %423 = vadd.xlane.f32.xlu1 %v422_v53  ;;  %v902_v4 = vsub.f32 %v2550_v7, %v886_v26  ;;  %v887_v53 = vrot.slane %v2562_v28, 7 }
 0x123   :  { %v652_v61 = vmul.f32 %v636_v63, %v636_v63  ;;  %1752 = vtanh.f32 %v908_v60  ;;  %v871_v63 = vsub.f32 %v2557_v47, %v855_v54 }
 0x124   :  { %1754 = vtanh.f32 %v926_v1 }
 0x125   :  { %696 = vrot.lane.b32.xlu2 %v652_v61, %s1896_s29  ;;  %1756 = vtanh.f32 %v907_v22 }
 0x126   :  { %1758 = vtanh.f32 %v925_v40 }
 0x128   :  { %v1751_v41 = vpop.eup %1750 }
 0x129   :  { %v639_v46 = vmul.f32 %v1751_v41, %v1749_v12  ;;  %v1753_v61 = vpop.eup %1752  ;;  %v910_v41 = vmul.f32 0.5, %v870_v39  ;;  %v2624_v39 = vld [vmem:[%s3066_s2 + $0x28] sm:$0xff] }
 0x12b   :  { %v655_v43 = vmul.f32 %v639_v46, %v639_v46  ;;  %v928_v46 = vmul.f32 %v2536_v5, %v902_v4  ;;  %1760 = vtanh.f32 %v910_v41  ;;  %v2629_v4 = vld [vmem:[%s3069_s5 + $0x28] sm:$0xff] }
 0x12d   :  { %702 = vrot.lane.b32.xlu2 %v655_v43, %s1896_s29  ;;  %v903_v43 = vsub.f32 %v2562_v28, %v887_v53  ;;  %1762 = vtanh.f32 %v928_v46 }
 0x13b   :  { %680 = vrot.lane.b32.xlu1 %v644_v9, %s1896_s29  ;;  %v1755_v9 = vpop.eup %1754 }
 0x143   :  { %686 = vrot.lane.b32.xlu1 %v647_v14, %s1896_s29  ;;  %v911_v14 = vmul.f32 0.5, %v871_v63 }
 0x145   :  { %1764 = vtanh.f32 %v911_v14 }
 0x14b   :  { %692 = vrot.lane.b32.xlu1 %v650_v6, %s1896_s29  ;;  %v1757_v6 = vpop.eup %1756 }
 0x153   :  { %698 = vrot.lane.b32.xlu1 %v653_v35, %s1896_s29  ;;  %v942_v35 = vmul.f32 %v1755_v9, %v1753_v61 }
 0x15f   :  { %v673_v8 = vpop.permute.xlu2 %672 }
 0x160   :  { %v720_v58 = vsel %vm421_vm11, %v673_v8, 0.0  ;;  %v2576_v8 = vld [vmem:[%s3066_s2 + $0x30] sm:$0xff] }
 0x167   :  { %v679_v10 = vpop.permute.xlu2 %678 }
 0x168   :  { %v729_v17 = vsel %vm421_vm11, %v679_v10, 0.0 }
 0x16a   :  { %v675_v23 = vpop.permute.xlu1 %674 }
 0x16b   :  { %v723_v3 = vsel %vm421_vm11, %v675_v23, 0.0  ;;  %v929_v23 = vmul.f32 %v2536_v5, %v903_v43  ;;  %v856_v43 = vrot.slane %v2624_v39, 7 }
 0x16c   :  { %724 = vadd.xlane.f32.xlu0 %v723_v3  ;;  %v1759_v3 = vpop.eup %1758 }
 0x16d   :  { %v941_v10 = vmul.f32 %v1759_v3, %v1757_v6  ;;  %1766 = vtanh.f32 %v929_v23  ;;  %v888_v6 = vrot.slane %v2629_v4, 7 }
 0x16f   :  { %v685_v51 = vpop.permute.xlu2 %684 }
 0x170   :  { %v738_v24 = vsel %vm421_vm11, %v685_v51, 0.0  ;;  %v2593_v51 = vld [vmem:[%s3069_s5 + $0x38] sm:$0xff] }
 0x173   :  { %v677_v45 = vpop.permute.xlu0 %676 }
 0x174   :  { %v726_v33 = vsel %vm421_vm11, %v677_v45, 0.0  ;;  %v2581_v45 = vld [vmem:[%s3069_s5 + $0x30] sm:$0xff] }
 0x175   :  { %727 = vadd.xlane.f32.xlu2 %v726_v33  ;;  %v950_v33 = vmul.f32 %v942_v35, %v942_v35 }
 0x177   :  { %v691_v30 = vpop.permute.xlu2 %690 }
 0x178   :  { %v747_v13 = vsel %vm421_vm11, %v691_v30, 0.0 }
 0x17b   :  { %v683_v56 = vpop.permute.xlu0 %682 }
 0x17c   :  { %v735_v19 = vsel %vm421_vm11, %v683_v56, 0.0  ;;  %v857_v56 = vrot.slane %v2576_v8, 7 }
 0x17d   :  { %736 = vadd.xlane.f32.xlu2 %v735_v19  ;;  %721 = vadd.xlane.f32.xlu1 %v720_v58  ;;  %v2587_v19 = vld [vmem:[%s3066_s2 + $0x38] sm:$0xff]  ;;  %v889_v58 = vrot.slane %v2581_v45, 7 }
 0x17f   :  { %v697_v32 = vpop.permute.xlu2 %696 }
 0x180   :  { %v756_v55 = vsel %vm421_vm11, %v697_v32, 0.0 }
 0x183   :  { %v689_v25 = vpop.permute.xlu0 %688 }
 0x184   :  { %v744_v18 = vsel %vm421_vm11, %v689_v25, 0.0  ;;  %v961_v25 = vsel %vm957_vm13, %v950_v33, 0.0 }
 0x185   :  { %745 = vadd.xlane.f32.xlu2 %v744_v18  ;;  %730 = vadd.xlane.f32.xlu1 %v729_v17  ;;  %v949_v18 = vmul.f32 %v941_v10, %v941_v10  ;;  %v873_v17 = vsub.f32 %v2576_v8, %v857_v56  ;;  %v872_v10 = vsub.f32 %v2624_v39, %v856_v43 }
 0x186   :  { %v904_v56 = vsub.f32 %v2629_v4, %v888_v6 }
 0x187   :  { %v703_v37 = vpop.permute.xlu2 %702  ;;  %v958_v30 = vsel %vm957_vm13, %v949_v18, 0.0 }
 0x188   :  { %v765_v12 = vsel %vm421_vm11, %v703_v37, 0.0 }
 0x18b   :  { %v695_v49 = vpop.permute.xlu0 %694 }
 0x18c   :  { %v753_v59 = vsel %vm421_vm11, %v695_v49, 0.0  ;;  %v2600_v49 = vld [vmem:[%s3066_s2 + $0x10] sm:$0xff]  ;;  %s1618_s2 = sld [smem:[#allocation3 + $0x3]] }
 0x18d   :  { %754 = vadd.xlane.f32.xlu2 %v753_v59  ;;  %739 = vadd.xlane.f32.xlu1 %v738_v24  ;;  %v905_v59 = vsub.f32 %v2581_v45, %v889_v58  ;;  %v858_v24 = vrot.slane %v2587_v19, 7  ;;  %v853_v29 = vrot.slane %v2600_v49, 7 }
 0x18f   :  { %v931_v32 = vmul.f32 %v2536_v5, %v905_v59  ;;  %v874_v16 = vsub.f32 %v2587_v19, %v858_v24  ;;  %v869_v57 = vsub.f32 %v2600_v49, %v853_v29  ;;  %v912_v24 = vmul.f32 0.5, %v872_v10 }
 0x191   :  { %v909_v46 = vmul.f32 0.5, %v869_v57 }
 0x193   :  { %v701_v38 = vpop.permute.xlu0 %700 }
 0x194   :  { %v762_v34 = vsel %vm421_vm11, %v701_v38, 0.0  ;;  %v2608_v38 = vld [vmem:[%s3069_s5 + $0x10] sm:$0xff]  ;;  %s1094_s5 = smul.f32 0.5, %s1618_s2 }
 0x195   :  { %763 = vadd.xlane.f32.xlu2 %v762_v34  ;;  %v424_v31 = vpop.xlane.xlu1 %423  ;;  %748 = vadd.xlane.f32.xlu1 %v747_v13  ;;  %v913_v34 = vmul.f32 0.5, %v873_v17  ;;  %v890_v13 = vrot.slane %v2593_v51, 7  ;;  %v885_v52 = vrot.slane %v2608_v38, 7 }
 0x196   :  { %v426_v27 = vperm.slane %v424_v31, %v2376_v48  ;;  %v1761_v31 = vpop.eup %1760 }
 0x197   :  { %v1763_v11 = vpop.eup %1762  ;;  %v906_v42 = vsub.f32 %v2593_v51, %v890_v13  ;;  %1768 = vtanh.f32 %v913_v34  ;;  %v901_v26 = vsub.f32 %v2608_v38, %v885_v52 }
 0x198   :  { %429 = vst.msk [vmem:[%s3071_s7] sm:$0x1] %vm428_vm12, %v426_v27  ;;  %v1765_v62 = vpop.eup %1764  ;;  %v944_v50 = vmul.f32 %v1763_v11, %v1761_v31  ;;  %1770 = vtanh.f32 %v931_v32 }
 0x199   :  { %v1767_v60 = vpop.eup %1766  ;;  %v932_v1 = vmul.f32 %v2536_v5, %v906_v42  ;;  %v927_v14 = vmul.f32 %v2536_v5, %v901_v26 }
 0x19a   :  { %v952_v22 = vmul.f32 %v944_v50, %v944_v50  ;;  %v945_v40 = vmul.f32 %v1767_v60, %v1765_v62 }
 0x19c   :  { %v967_v37 = vsel %vm957_vm13, %v952_v22, 0.0  ;;  %v953_v54 = vmul.f32 %v945_v40, %v945_v40 }
 0x19d   :  { %757 = vadd.xlane.f32.xlu1 %v756_v55  ;;  %959 = vadd.xlane.f32.xlu2 %v958_v30  ;;  %v914_v55 = vmul.f32 0.5, %v874_v16  ;;  %v1769_v53 = vpop.eup %1768  ;;  %v930_v30 = vmul.f32 %v2536_v5, %v904_v56 }
 0x19e   :  { %v970_v61 = vsel %vm957_vm13, %v953_v54, 0.0 }
 0x19f   :  { %1772 = vtanh.f32 %v914_v55  ;;  %v785_v55 = vadd.s32 4294967288, %v2376_v48 }
 0x1a0   :  { %1774 = vtanh.f32 %v932_v1 }
 0x1a1   :  { %1776 = vtanh.f32 %v909_v46 }
 0x1a2   :  { %1778 = vtanh.f32 %v927_v14 }
 0x1a3   :  { %1780 = vtanh.f32 %v912_v24 }
 0x1a4   :  { %1782 = vtanh.f32 %v930_v30 }
 0x1a5   :  { %766 = vadd.xlane.f32.xlu1 %v765_v12  ;;  %968 = vadd.xlane.f32.xlu2 %v967_v37  ;;  %v1771_v12 = vpop.eup %1770 }
 0x1a6   :  { %v1773_v9 = vpop.eup %1772  ;;  %v947_v35 = vmul.f32 %v1771_v12, %v1769_v53 }
 0x1a7   :  { %v1775_v23 = vpop.eup %1774 }
 0x1a8   :  { %v955_v3 = vmul.f32 %v947_v35, %v947_v35  ;;  %v948_v33 = vmul.f32 %v1775_v23, %v1773_v9  ;;  %v1777_v34 = vpop.eup %1776 }
 0x1a9   :  { %v1779_v13 = vpop.eup %1778 }
 0x1aa   :  { %v976_v58 = vsel %vm957_vm13, %v955_v3, 0.0  ;;  %v943_v31 = vmul.f32 %v1779_v13, %v1777_v34  ;;  %v1781_v16 = vpop.eup %1780 }
 0x1ac   :  { %v951_v11 = vmul.f32 %v943_v31, %v943_v31 }
 0x1ad   :  { %v681_v27 = vpop.permute.xlu1 %680  ;;  %962 = vadd.xlane.f32.xlu1 %v961_v25  ;;  %v956_v25 = vmul.f32 %v948_v33, %v948_v33  ;;  %977 = vadd.xlane.f32.xlu2 %v976_v58 }
 0x1ae   :  { %v732_v20 = vsel %vm421_vm11, %v681_v27, 0.0  ;;  %v964_v29 = vsel %vm957_vm13, %v951_v11, 0.0 }
 0x1af   :  { %733 = vadd.xlane.f32.xlu0 %v732_v20  ;;  %v979_v17 = vsel %vm957_vm13, %v956_v25, 0.0  ;;  %v1783_v20 = vpop.eup %1782 }
 0x1b0   :  { %v946_v42 = vmul.f32 %v1783_v20, %v1781_v16 }
 0x1b2   :  { %v954_v62 = vmul.f32 %v946_v42, %v946_v42 }
 0x1b4   :  { %v973_v52 = vsel %vm957_vm13, %v954_v62, 0.0 }
 0x1b5   :  { %v687_v63 = vpop.permute.xlu1 %686  ;;  %971 = vadd.xlane.f32.xlu1 %v970_v61 }
 0x1b6   :  { %v741_v41 = vsel %vm421_vm11, %v687_v63, 0.0 }
 0x1b7   :  { %742 = vadd.xlane.f32.xlu0 %v741_v41 }
 0x1bd   :  { %v693_v18 = vpop.permute.xlu1 %692  ;;  %980 = vadd.xlane.f32.xlu1 %v979_v17 }
 0x1be   :  { %v750_v59 = vsel %vm421_vm11, %v693_v18, 0.0 }
 0x1bf   :  { %751 = vadd.xlane.f32.xlu0 %v750_v59 }
 0x1c5   :  { %v699_v27 = vpop.permute.xlu1 %698  ;;  %1014 = vrot.lane.b32.xlu2 %v2518_v21, %s1895_s4 }
 0x1c6   :  { %v759_v32 = vsel %vm421_vm11, %v699_v27, 0.0 }
 0x1c7   :  { %760 = vadd.xlane.f32.xlu0 %v759_v32 }
 0x1cd   :  { %1020 = vrot.lane.b32.xlu2 %v2545_v15, %s1895_s4 }
 0x1cf   :  { %965 = vadd.xlane.f32.xlu0 %v964_v29 }
 0x1d5   :  { %1026 = vrot.lane.b32.xlu2 %v2576_v8, %s1895_s4 }
 0x1d6   :  { %1016 = vrot.lane.b32.xlu1 %v2508_v0, %s1895_s4 }
 0x1d7   :  { %974 = vadd.xlane.f32.xlu0 %v973_v52 }
 0x1dd   :  { %1048 = vrot.lane.b32.xlu2 %v2513_v44, %s1895_s4 }
 0x1de   :  { %1024 = vrot.lane.b32.xlu1 %v2624_v39, %s1895_s4 }
 0x1df   :  { %v725_v60 = vpop.xlane.xlu0 %724 }
 0x1e0   :  { %v786_v57 = vperm.slane %v725_v60, %v785_v55 }
 0x1e5   :  { %1054 = vrot.lane.b32.xlu2 %v2562_v28, %s1895_s4 }
 0x1e6   :  { %1046 = vrot.lane.b32.xlu1 %v2529_v2, %s1895_s4 }
 0x1e8   :  { %v728_v5 = vpop.xlane.xlu2 %727 }
 0x1e9   :  { %v789_v26 = vperm.slane %v728_v5, %v2376_v48 }
 0x1ed   :  { %1060 = vrot.lane.b32.xlu2 %v2593_v51, %s1895_s4 }
 0x1ee   :  { %1052 = vrot.lane.b32.xlu1 %v2550_v7, %s1895_s4 }
 0x1f0   :  { %v722_v50 = vpop.xlane.xlu1 %721  ;;  %v737_v22 = vpop.xlane.xlu2 %736 }
 0x1f1   :  { %v784_v1 = vperm.slane %v722_v50, %v2376_v48  ;;  %v793_v58 = vperm.slane %v737_v22, %v785_v55 }
 0x1f3   :  { %v788_v54 = vsel %vm787_vm14, %v786_v57, %v784_v1 }
 0x1f6   :  { %1058 = vrot.lane.b32.xlu1 %v2581_v45, %s1895_s4 }
 0x1f8   :  { %v731_v40 = vpop.xlane.xlu1 %730  ;;  %v746_v12 = vpop.xlane.xlu2 %745 }
 0x1f9   :  { %v790_v37 = vperm.slane %v731_v40, %v785_v55  ;;  %v798_v46 = vperm.slane %v746_v12, %v2376_v48 }
 0x1fb   :  { %v791_v53 = vsel %vm787_vm14, %v790_v37, %v789_v26 }
 0x1fc   :  { %v810_v63 = vsel %vm406_vm4, %v791_v53, %v788_v54 }
 0x200   :  { %v740_v61 = vpop.xlane.xlu1 %739  ;;  %v755_v14 = vpop.xlane.xlu2 %754 }
 0x201   :  { %v795_v24 = vperm.slane %v740_v61, %v2376_v48  ;;  %v802_v32 = vperm.slane %v755_v14, %v785_v55 }
 0x208   :  { %v749_v41 = vpop.xlane.xlu1 %748  ;;  %v764_v35 = vpop.xlane.xlu2 %763 }
 0x209   :  { %v799_v43 = vperm.slane %v749_v41, %v785_v55  ;;  %v807_v3 = vperm.slane %v764_v35, %v2376_v48 }
 0x20b   :  { %v800_v9 = vsel %vm787_vm14, %v799_v43, %v798_v46 }
 0x210   :  { %v758_v6 = vpop.xlane.xlu1 %757  ;;  %v960_v11 = vpop.xlane.xlu2 %959 }
 0x211   :  { %v804_v52 = vperm.slane %v758_v6, %v2376_v48  ;;  %v990_v26 = vperm.slane %v960_v11, %v2396_v36 }
 0x218   :  { %v767_v23 = vpop.xlane.xlu1 %766  ;;  %v969_v60 = vpop.xlane.xlu2 %968 }
 0x219   :  { %v808_v33 = vperm.slane %v767_v23, %v785_v55 }
 0x21b   :  { %v809_v10 = vsel %vm787_vm14, %v808_v33, %v807_v3 }
 0x220   :  { %v963_v20 = vpop.xlane.xlu1 %962  ;;  %v978_v61 = vpop.xlane.xlu2 %977 }
 0x221   :  { %v991_v57 = vperm.slane %v963_v20, %v2396_v36 }
 0x222   :  { %v734_v56 = vpop.xlane.xlu0 %733 }
 0x223   :  { %v792_v25 = vperm.slane %v734_v56, %v2376_v48  ;;  %v998_v53 = vsel %vm406_vm4, %v991_v57, %v990_v26 }
 0x225   :  { %v794_v18 = vsel %vm787_vm14, %v793_v58, %v792_v25 }
 0x226   :  { %v811_v17 = vsel %vm408_vm5, %v794_v18, %v810_v63 }
 0x228   :  { %v972_v1 = vpop.xlane.xlu1 %971  ;;  %v1015_v56 = vpop.permute.xlu2 %1014 }
 0x229   :  { %v994_v12 = vperm.slane %v972_v1, %v2396_v36 }
 0x22a   :  { %v743_v59 = vpop.xlane.xlu0 %742 }
 0x22b   :  { %v796_v30 = vperm.slane %v743_v59, %v785_v55 }
 0x22d   :  { %v797_v34 = vsel %vm787_vm14, %v796_v30, %v795_v24 }
 0x22e   :  { %v812_v13 = vsel %vm410_vm6, %v797_v34, %v811_v17 }
 0x22f   :  { %v813_v31 = vsel %vm412_vm7, %v800_v9, %v812_v13  ;;  %v996_v9 = vperm.slane %v978_v61, %v2396_v36  ;;  %v2719_v13 = vstv %s1094_s5 }
 0x230   :  { %v981_v41 = vpop.xlane.xlu1 %980  ;;  %v1021_v25 = vpop.permute.xlu2 %1020 }
 0x231   :  { %v997_v6 = vperm.slane %v981_v41, %v2396_v36 }
 0x232   :  { %v752_v27 = vpop.xlane.xlu0 %751 }
 0x233   :  { %v801_v16 = vperm.slane %v752_v27, %v2376_v48 }
 0x235   :  { %v803_v29 = vsel %vm787_vm14, %v802_v32, %v801_v16  ;;  %v1038_v32 = vsub.f32 %v2518_v21, %v1015_v56 }
 0x236   :  { %v814_v42 = vsel %vm414_vm8, %v803_v29, %v813_v31 }
 0x238   :  { %v2713_v17 = vpop.permute.xlu2 %1026 }
 0x23a   :  { %v761_v62 = vpop.xlane.xlu0 %760 }
 0x23b   :  { %v805_v5 = vperm.slane %v761_v62, %v785_v55  ;;  %v993_v55 = vperm.slane %v969_v60, %v2396_v36 }
 0x23d   :  { %v806_v50 = vsel %vm787_vm14, %v805_v5, %v804_v52 }
 0x23e   :  { %v815_v22 = vsel %vm416_vm9, %v806_v50, %v814_v42  ;;  %v1041_v42 = vsub.f32 %v2545_v15, %v1021_v25  ;;  %v2783_v25 = vld [vmem:[%s3067_s3 + $0x18] sm:$0xf] }
 0x23f   :  { %v2691_v40 = vsel %vm418_vm10, %v809_v10, %v815_v22 }
 0x240   :  { %v1049_v24 = vpop.permute.xlu2 %1048 }
 0x241   :  { %v1071_v30 = vsub.f32 %v2513_v44, %v1049_v24  ;;  %v2793_v24 = vld [vmem:[%s3067_s3 + $0x4] sm:$0xf] }
 0x242   :  { %v966_v37 = vpop.xlane.xlu0 %965 }
 0x243   :  { %v992_v54 = vperm.slane %v966_v37, %v2396_v36  ;;  %v1097_v27 = vmul.f32 %v2719_v13, %v1071_v30  ;;  %v2740_v37 = vld [vmem:[%s3067_s3] sm:$0xf] }
 0x245   :  { %v999_v63 = vsel %vm408_vm5, %v992_v54, %v998_v53  ;;  %v2747_v54 = vld [vmem:[%s3070_s6 + $0x4] sm:$0xf] }
 0x246   :  { %v1000_v46 = vsel %vm410_vm6, %v993_v55, %v999_v63  ;;  %v818_v63 = vsel %vm315_vm2, %v2691_v40, 0.0  ;;  %vm1208_vm2 = vcmask 64512  }
 0x247   :  { %v1001_v35 = vsel %vm412_vm7, %v994_v12, %v1000_v46 }
 0x248   :  { %v1017_v58 = vpop.permute.xlu1 %1016  ;;  %v1055_v12 = vpop.permute.xlu2 %1054 }
 0x249   :  { %v1039_v59 = vsub.f32 %v2508_v0, %v1017_v58  ;;  %v1078_v0 = vmul.f32 0.5, %v1038_v32  ;;  %v1074_v41 = vsub.f32 %v2562_v28, %v1055_v12  ;;  %v2773_v28 = vld [vmem:[%s3070_s6 + $0x10] sm:$0xf]  ;;  %v2802_v32 = vld [vmem:[%s3067_s3 + $0x8] sm:$0xf] }
 0x24a   :  { %v975_v43 = vpop.xlane.xlu0 %974 }
 0x24b   :  { %v995_v14 = vperm.slane %v975_v43, %v2396_v36  ;;  %v1079_v34 = vmul.f32 0.5, %v1039_v59  ;;  %v1100_v46 = vmul.f32 %v2719_v13, %v1074_v41 }
 0x24d   :  { %v1002_v23 = vsel %vm414_vm8, %v995_v14, %v1001_v35  ;;  %1784 = vtanh.f32 %v1079_v34  ;;  %v2764_v14 = vld [vmem:[%s3067_s3 + $0xc] sm:$0xf] }
 0x24e   :  { %v1003_v3 = vsel %vm416_vm9, %v996_v9, %v1002_v23  ;;  %1786 = vtanh.f32 %v1097_v27 }
 0x24f   :  { %v1004_v33 = vsel %vm418_vm10, %v997_v6, %v1003_v3  ;;  %1788 = vtanh.f32 %v1078_v0 }
 0x250   :  { %v1007_v10 = vsel %vm1006_vm15, %v1004_v33, 0.0  ;;  %v2711_v18 = vpop.permute.xlu1 %1024 }
 0x251   :  { %1008 = vadd.xlane.f32.xlu0 %v1007_v10 }
 0x253   :  { %v1785_v20 = vpop.eup %1784 }
 0x254   :  { %v1787_v29 = vpop.eup %1786 }
 0x255   :  { %v1113_v21 = vmul.f32 %v1787_v29, %v1785_v20  ;;  %v1789_v50 = vpop.eup %1788 }
 0x257   :  { %v1121_v52 = vmul.f32 %v1113_v21, %v1113_v21 }
 0x258   :  { %v1047_v31 = vpop.permute.xlu1 %1046 }
 0x259   :  { %v1070_v16 = vsub.f32 %v2529_v2, %v1047_v31  ;;  %v1081_v2 = vmul.f32 0.5, %v1041_v42  ;;  %1138 = vrot.lane.b32.xlu1 %v1121_v52, %s1896_s29 }
 0x25b   :  { %v1096_v11 = vmul.f32 %v2719_v13, %v1070_v16 }
 0x25d   :  { %1790 = vtanh.f32 %v1096_v11 }
 0x25e   :  { %1792 = vtanh.f32 %v1081_v2 }
 0x260   :  { %v1053_v44 = vpop.permute.xlu1 %1052 }
 0x261   :  { %v1073_v62 = vsub.f32 %v2550_v7, %v1053_v44  ;;  %v2817_v44 = vld [vmem:[%s3070_s6 + $0xc] sm:$0xf] }
 0x263   :  { %v1099_v5 = vmul.f32 %v2719_v13, %v1073_v62  ;;  %v1791_v60 = vpop.eup %1790  ;;  %v1044_v62 = vsub.f32 %v2576_v8, %v2713_v17  ;;  %v2843_v8 = vld [vmem:[%s3070_s6 + $0x18] sm:$0xf] }
 0x264   :  { %v1112_v15 = vmul.f32 %v1791_v60, %v1789_v50  ;;  %v1793_v1 = vpop.eup %1792  ;;  %v2834_v50 = vld [vmem:[%s3070_s6] sm:$0xf] }
 0x265   :  { %1018 = vrot.lane.b32.xlu0 %v2600_v49, %s1895_s4  ;;  %1794 = vtanh.f32 %v1099_v5  ;;  %v1084_v2 = vmul.f32 0.5, %v1044_v62  ;;  %v2829_v5 = vld [vmem:[%s3067_s3 + $0x14] sm:$0xf] }
 0x266   :  { %v1120_v7 = vmul.f32 %v1112_v15, %v1112_v15  ;;  %1796 = vtanh.f32 %v1100_v46 }
 0x268   :  { %v1059_v29 = vpop.permute.xlu1 %1058 }
 0x269   :  { %v1076_v21 = vsub.f32 %v2581_v45, %v1059_v29  ;;  %v2848_v45 = vld [vmem:[%s3070_s6 + $0x8] sm:$0xf] }
 0x26b   :  { %v1795_v22 = vpop.eup %1794  ;;  %v1102_v52 = vmul.f32 %v2719_v13, %v1076_v21 }
 0x26c   :  { %v1115_v57 = vmul.f32 %v1795_v22, %v1793_v1  ;;  %v1797_v35 = vpop.eup %1796  ;;  %v2859_v22 = vld [vmem:[%s3067_s3 + $0x10] sm:$0xf] }
 0x26d   :  { %1022 = vrot.lane.b32.xlu0 %v2557_v47, %s1895_s4 }
 0x26e   :  { %v1123_v26 = vmul.f32 %v1115_v57, %v1115_v57 }
 0x275   :  { %1028 = vrot.lane.b32.xlu0 %v2587_v19, %s1895_s4 }
 0x27d   :  { %1050 = vrot.lane.b32.xlu0 %v2608_v38, %s1895_s4 }
 0x285   :  { %1056 = vrot.lane.b32.xlu0 %v2629_v4, %s1895_s4 }
 0x28d   :  { %1136 = vrot.lane.b32.xlu0 %v1120_v7, %s1896_s29  ;;  %v1061_v7 = vpop.permute.xlu2 %1060 }
 0x295   :  { %1142 = vrot.lane.b32.xlu0 %v1123_v26, %s1896_s29  ;;  %v1077_v26 = vsub.f32 %v2593_v51, %v1061_v7  ;;  %v2880_v51 = vld [vmem:[%s3067_s3 + $0x1c] sm:$0xf]  ;;  %s1620_s3 = sld [smem:[#allocation3 + $0x5]] }
 0x29d   :  { %1405 = vrot.lane.b32.xlu0 %v2740_v37, %s1895_s4 }
 0x2a5   :  { %1439 = vrot.lane.b32.xlu0 %v2747_v54, %s1895_s4 }
 0x2c4   :  { %v1009_v53 = vpop.xlane.xlu0 %1008 }
 0x2c5   :  { %v1011_v55 = vperm.slane %v1009_v53, %v2376_v48 }
 0x2c7   :  { %1013 = vst.msk [vmem:[%s3071_s7 + $0x1] sm:$0x1] %vm428_vm12, %v1011_v55  ;;  %v1103_v55 = vmul.f32 %v2719_v13, %v1077_v26 }
 0x2cf   :  { %819 = vadd.xlane.f32.xlu0 %v818_v63 }
 0x2d7   :  { %v1019_v61 = vpop.permute.xlu0 %1018 }
 0x2d8   :  { %v1040_v23 = vsub.f32 %v2600_v49, %v1019_v61  ;;  %v1043_v49 = vsub.f32 %v2624_v39, %v2711_v18  ;;  %v2871_v61 = vld [vmem:[%s3070_s6 + $0x14] sm:$0xf] }
 0x2da   :  { %v1080_v10 = vmul.f32 0.5, %v1040_v23 }
 0x2df   :  { %v1023_v43 = vpop.permute.xlu0 %1022 }
 0x2e0   :  { %v1042_v9 = vsub.f32 %v2557_v47, %v1023_v43 }
 0x2e2   :  { %v1082_v6 = vmul.f32 0.5, %v1042_v9 }
 0x2e3   :  { %1411 = vrot.lane.b32.xlu0 %v2764_v14, %s1895_s4 }
 0x2e4   :  { %1798 = vtanh.f32 %v1082_v6 }
 0x2e5   :  { %1800 = vtanh.f32 %v1080_v10 }
 0x2e7   :  { %v2768_v40 = vpop.permute.xlu0 %1028 }
 0x2e8   :  { %v1045_v53 = vsub.f32 %v2587_v19, %v2768_v40 }
 0x2ea   :  { %v1799_v47 = vpop.eup %1798  ;;  %v1085_v63 = vmul.f32 0.5, %v1045_v53 }
 0x2eb   :  { %v1116_v3 = vmul.f32 %v1799_v47, %v1797_v35  ;;  %1445 = vrot.lane.b32.xlu0 %v2773_v28, %s1895_s4  ;;  %v1801_v31 = vpop.eup %1800  ;;  %v2890_v35 = vpop.permute.xlu1 %1138 }
 0x2ed   :  { %v1124_v33 = vmul.f32 %v1116_v3, %v1116_v3 }
 0x2ef   :  { %1144 = vrot.lane.b32.xlu1 %v1124_v33, %s1896_s29  ;;  %v1051_v56 = vpop.permute.xlu0 %1050 }
 0x2f0   :  { %v1072_v58 = vsub.f32 %v2608_v38, %v1051_v56  ;;  %v1083_v38 = vmul.f32 0.5, %v1043_v49 }
 0x2f2   :  { %v1098_v59 = vmul.f32 %v2719_v13, %v1072_v58 }
 0x2f3   :  { %1417 = vrot.lane.b32.xlu0 %v2783_v25, %s1895_s4 }
 0x2f4   :  { %1802 = vtanh.f32 %v1098_v59 }
 0x2f5   :  { %1804 = vtanh.f32 %v1083_v38 }
 0x2f7   :  { %1407 = vrot.lane.b32.xlu1 %v2793_v24, %s1895_s4  ;;  %v1057_v30 = vpop.permute.xlu0 %1056 }
 0x2f8   :  { %v1075_v34 = vsub.f32 %v2629_v4, %v1057_v30  ;;  %v2810_v4 = vld [vmem:[%s3070_s6 + $0x1c] sm:$0xf] }
 0x2fa   :  { %v1803_v27 = vpop.eup %1802  ;;  %v1101_v39 = vmul.f32 %v2719_v13, %v1075_v34 }
 0x2fb   :  { %v1114_v18 = vmul.f32 %v1803_v27, %v1801_v31  ;;  %1451 = vrot.lane.b32.xlu0 %v2810_v4, %s1895_s4  ;;  %v1805_v0 = vpop.eup %1804 }
 0x2fc   :  { %1806 = vtanh.f32 %v1101_v39 }
 0x2fd   :  { %v1122_v16 = vmul.f32 %v1114_v18, %v1114_v18  ;;  %1808 = vtanh.f32 %v1084_v2 }
 0x2fe   :  { %1810 = vtanh.f32 %v1102_v52 }
 0x2ff   :  { %1409 = vrot.lane.b32.xlu1 %v2802_v32, %s1895_s4  ;;  %1140 = vrot.lane.b32.xlu2 %v1122_v16, %s1896_s29  ;;  %v2854_v1 = vpop.permute.xlu0 %1136  ;;  %1812 = vtanh.f32 %v1103_v55 }
 0x300   :  { %1814 = vtanh.f32 %v1085_v63 }
 0x302   :  { %v1807_v11 = vpop.eup %1806 }
 0x303   :  { %v1117_v20 = vmul.f32 %v1807_v11, %v1805_v0  ;;  %v1809_v17 = vpop.eup %1808 }
 0x304   :  { %v1811_v60 = vpop.eup %1810 }
 0x305   :  { %v1125_v42 = vmul.f32 %v1117_v20, %v1117_v20  ;;  %v1118_v15 = vmul.f32 %v1811_v60, %v1809_v17  ;;  %v1813_v19 = vpop.eup %1812 }
 0x306   :  { %v1815_v13 = vpop.eup %1814 }
 0x307   :  { %1443 = vrot.lane.b32.xlu1 %v2817_v44, %s1895_s4  ;;  %1146 = vrot.lane.b32.xlu2 %v1125_v42, %s1896_s29  ;;  %v1126_v57 = vmul.f32 %v1118_v15, %v1118_v15  ;;  %v2873_v12 = vpop.permute.xlu0 %1142  ;;  %v1119_v46 = vmul.f32 %v1815_v13, %v1813_v19 }
 0x309   :  { %v1127_v43 = vmul.f32 %v1119_v46, %v1119_v46 }
 0x30f   :  { %1415 = vrot.lane.b32.xlu1 %v2829_v5, %s1895_s4  ;;  %1437 = vrot.lane.b32.xlu2 %v2834_v50, %s1895_s4  ;;  %v1406_v41 = vpop.permute.xlu0 %1405 }
 0x310   :  { %v1429_v33 = vsub.f32 %v2740_v37, %v1406_v41 }
 0x312   :  { %v1469_v59 = vmul.f32 0.5, %v1429_v33 }
 0x314   :  { %1816 = vtanh.f32 %v1469_v59 }
 0x317   :  { %1449 = vrot.lane.b32.xlu1 %v2843_v8, %s1895_s4  ;;  %1441 = vrot.lane.b32.xlu2 %v2848_v45, %s1895_s4  ;;  %v1440_v9 = vpop.permute.xlu0 %1439 }
 0x318   :  { %v1462_v10 = vsub.f32 %v2747_v54, %v1440_v9 }
 0x31a   :  { %v1817_v11 = vpop.eup %1816 }
 0x31f   :  { %1148 = vrot.lane.b32.xlu1 %v1126_v57, %s1896_s29  ;;  %1413 = vrot.lane.b32.xlu2 %v2859_v22, %s1895_s4 }
 0x327   :  { %1447 = vrot.lane.b32.xlu2 %v2871_v61, %s1895_s4 }
 0x32f   :  { %1419 = vrot.lane.b32.xlu2 %v2880_v51, %s1895_s4  ;;  %s1485_s4 = smul.f32 0.5, %s1620_s3 }
 0x331   :  { %v2900_v56 = vstv %s1485_s4 }
 0x332   :  { %v1488_v49 = vmul.f32 %v2900_v56, %v1462_v10 }
 0x334   :  { %1818 = vtanh.f32 %v1488_v49 }
 0x337   :  { %1150 = vrot.lane.b32.xlu2 %v1127_v43, %s1896_s29 }
 0x33a   :  { %v1819_v42 = vpop.eup %1818 }
 0x342   :  { %v820_v6 = vpop.xlane.xlu0 %819 }
 0x343   :  { %v822_v40 = vperm.slane %v820_v6, %v2376_v48 }
 0x345   :  { %824 = vst.msk [vmem:[%s3072_s8] sm:$0x1] %vm428_vm12, %v822_v40 }
 0x355   :  { %v1412_v58 = vpop.permute.xlu0 %1411 }
 0x356   :  { %v1432_v52 = vsub.f32 %v2764_v14, %v1412_v58 }
 0x358   :  { %v1472_v53 = vmul.f32 0.5, %v1432_v52 }
 0x359   :  { %v2892_v47 = vpop.permute.xlu2 %1140 }
 0x35d   :  { %v1446_v18 = vpop.permute.xlu0 %1445 }
 0x35e   :  { %v1465_v15 = vsub.f32 %v2773_v28, %v1446_v18 }
 0x360   :  { %v1491_v19 = vmul.f32 %v2900_v56, %v1465_v15 }
 0x361   :  { %v2894_v23 = vpop.permute.xlu1 %1144  ;;  %v2896_v3 = vpop.permute.xlu2 %1146 }
 0x365   :  { %v1418_v46 = vpop.permute.xlu0 %1417 }
 0x369   :  { %v1408_v38 = vpop.permute.xlu1 %1407  ;;  %v1438_v30 = vpop.permute.xlu2 %1437 }
 0x36a   :  { %v1430_v34 = vsub.f32 %v2793_v24, %v1408_v38  ;;  %v1461_v31 = vsub.f32 %v2834_v50, %v1438_v30 }
 0x36c   :  { %v1470_v27 = vmul.f32 0.5, %v1430_v34  ;;  %v1487_v39 = vmul.f32 %v2900_v56, %v1461_v31 }
 0x36d   :  { %v1452_v34 = vpop.permute.xlu0 %1451 }
 0x36e   :  { %1820 = vtanh.f32 %v1470_v27 }
 0x36f   :  { %1822 = vtanh.f32 %v1487_v39 }
 0x371   :  { %v1410_v16 = vpop.permute.xlu1 %1409  ;;  %v1442_v0 = vpop.permute.xlu2 %1441 }
 0x372   :  { %v1431_v20 = vsub.f32 %v2802_v32, %v1410_v16  ;;  %v1463_v29 = vsub.f32 %v2848_v45, %v1442_v0  ;;  %v1435_v16 = vsub.f32 %v2783_v25, %v1418_v46 }
 0x374   :  { %v1821_v62 = vpop.eup %1820  ;;  %v1471_v21 = vmul.f32 0.5, %v1431_v20  ;;  %v1489_v2 = vmul.f32 %v2900_v56, %v1463_v29  ;;  %v1468_v20 = vsub.f32 %v2810_v4, %v1452_v34  ;;  %v1274_v34 = vrot.slane %v2834_v50, 7 }
 0x375   :  { %v1823_v17 = vpop.eup %1822  ;;  %v1504_v60 = vmul.f32 %v1821_v62, %v1819_v42  ;;  %v1475_v62 = vmul.f32 0.5, %v1435_v16 }
 0x376   :  { %1824 = vtanh.f32 %v1471_v21  ;;  %v1503_v7 = vmul.f32 %v1823_v17, %v1817_v11  ;;  %v1494_v17 = vmul.f32 %v2900_v56, %v1468_v20 }
 0x377   :  { %1826 = vtanh.f32 %v1489_v2  ;;  %v1512_v57 = vmul.f32 %v1504_v60, %v1504_v60 }
 0x378   :  { %v1511_v26 = vmul.f32 %v1503_v7, %v1503_v7  ;;  %1828 = vtanh.f32 %v1472_v53 }
 0x379   :  { %v1444_v55 = vpop.permute.xlu1 %1443  ;;  %v1414_v63 = vpop.permute.xlu2 %1413  ;;  %1529 = vrot.lane.b32.xlu1 %v1512_v57, %s1896_s29  ;;  %1830 = vtanh.f32 %v1491_v19 }
 0x37a   :  { %v1464_v13 = vsub.f32 %v2817_v44, %v1444_v55  ;;  %v1433_v41 = vsub.f32 %v2859_v22, %v1414_v63  ;;  %1527 = vrot.lane.b32.xlu0 %v1511_v26, %s1896_s29 }
 0x37c   :  { %v1825_v43 = vpop.eup %1824  ;;  %v1490_v9 = vmul.f32 %v2900_v56, %v1464_v13  ;;  %v1473_v6 = vmul.f32 0.5, %v1433_v41 }
 0x37d   :  { %v1827_v40 = vpop.eup %1826 }
 0x37e   :  { %1832 = vtanh.f32 %v1490_v9  ;;  %v1505_v33 = vmul.f32 %v1827_v40, %v1825_v43  ;;  %v1829_v49 = vpop.eup %1828 }
 0x37f   :  { %1834 = vtanh.f32 %v1473_v6  ;;  %v1831_v31 = vpop.eup %1830 }
 0x380   :  { %v1513_v10 = vmul.f32 %v1505_v33, %v1505_v33  ;;  %v1275_v33 = vrot.slane %v2747_v54, 7 }
 0x381   :  { %v1416_v58 = vpop.permute.xlu1 %1415  ;;  %v1448_v59 = vpop.permute.xlu2 %1447 }
 0x382   :  { %v1434_v38 = vsub.f32 %v2829_v5, %v1416_v58  ;;  %1531 = vrot.lane.b32.xlu2 %v1513_v10, %s1896_s29  ;;  %v1466_v30 = vsub.f32 %v2871_v61, %v1448_v59  ;;  %v1291_v58 = vsub.f32 %v2747_v54, %v1275_v33  ;;  %v2936_v59 = vstv %s1314_s9 }
 0x383   :  { %v1247_v33 = vrot.slane %v2829_v5, 7 }
 0x384   :  { %v1833_v27 = vpop.eup %1832  ;;  %v1474_v39 = vmul.f32 0.5, %v1434_v38  ;;  %v1492_v18 = vmul.f32 %v2900_v56, %v1466_v30  ;;  %v1317_v38 = vmul.f32 %v2936_v59, %v1291_v58  ;;  %v1242_v30 = vrot.slane %v2740_v37, 7 }
 0x385   :  { %v1835_v0 = vpop.eup %1834  ;;  %v1506_v11 = vmul.f32 %v1833_v27, %v1829_v49  ;;  %v1290_v27 = vsub.f32 %v2834_v50, %v1274_v34  ;;  %v1163_v50 = vsel %vm1006_vm15, %v2890_v35, 0.0  ;;  %v1279_v58 = vrot.slane %v2871_v61, 7 }
 0x386   :  { %1836 = vtanh.f32 %v1474_v39  ;;  %v1507_v29 = vmul.f32 %v1835_v0, %v1831_v31  ;;  %v1258_v31 = vsub.f32 %v2740_v37, %v1242_v30  ;;  %v1160_v0 = vsel %vm1006_vm15, %v2854_v1, 0.0 }
 0x387   :  { %1838 = vtanh.f32 %v1492_v18  ;;  %v1514_v42 = vmul.f32 %v1506_v11, %v1506_v11  ;;  %v1316_v54 = vmul.f32 %v2936_v59, %v1290_v27  ;;  %v1166_v1 = vsel %vm1006_vm15, %v2892_v47, 0.0 }
 0x388   :  { %v1515_v21 = vmul.f32 %v1507_v29, %v1507_v29  ;;  %1840 = vtanh.f32 %v1475_v62  ;;  %v1245_v47 = vrot.slane %v2764_v14, 7  ;;  %v1263_v30 = vsub.f32 %v2829_v5, %v1247_v33 }
 0x389   :  { %v1450_v2 = vpop.permute.xlu1 %1449  ;;  %v1420_v52 = vpop.permute.xlu2 %1419  ;;  %1533 = vrot.lane.b32.xlu0 %v1514_v42, %s1896_s29  ;;  %1842 = vtanh.f32 %v1494_v17  ;;  %v1276_v17 = vrot.slane %v2848_v45, 7 }
 0x38a   :  { %v1467_v60 = vsub.f32 %v2843_v8, %v1450_v2  ;;  %v1436_v15 = vsub.f32 %v2880_v51, %v1420_v52  ;;  %1535 = vrot.lane.b32.xlu1 %v1515_v21, %s1896_s29  ;;  %v1169_v2 = vsel %vm1006_vm15, %v2873_v12, 0.0  ;;  %v1244_v52 = vrot.slane %v2802_v32, 7 }
 0x38c   :  { %v1837_v7 = vpop.eup %1836  ;;  %v1493_v57 = vmul.f32 %v2900_v56, %v1467_v60  ;;  %v1476_v26 = vmul.f32 0.5, %v1436_v15  ;;  %v1243_v56 = vrot.slane %v2793_v24, 7  ;;  %v1260_v35 = vsub.f32 %v2802_v32, %v1244_v52 }
 0x38d   :  { %v1839_v53 = vpop.eup %1838  ;;  %v1292_v60 = vsub.f32 %v2848_v45, %v1276_v17  ;;  %v1172_v15 = vsel %vm1006_vm15, %v2894_v23, 0.0  ;;  %v1175_v32 = vsel %vm1006_vm15, %v2896_v3, 0.0  ;;  %v1249_v17 = vrot.slane %v2880_v51, 7 }
 0x38e   :  { %1844 = vtanh.f32 %v1493_v57  ;;  %v1508_v55 = vmul.f32 %v1839_v53, %v1837_v7  ;;  %v1841_v19 = vpop.eup %1840  ;;  %v1259_v10 = vsub.f32 %v2793_v24, %v1243_v56  ;;  %v1298_v24 = vmul.f32 0.5, %v1258_v31 }
 0x38f   :  { %1846 = vtanh.f32 %v1476_v26  ;;  %v1843_v13 = vpop.eup %1842  ;;  %v1300_v7 = vmul.f32 0.5, %v1260_v35  ;;  %v1277_v57 = vrot.slane %v2817_v44, 7  ;;  %v1318_v12 = vmul.f32 %v2936_v59, %v1292_v60 }
 0x390   :  { %v1516_v63 = vmul.f32 %v1508_v55, %v1508_v55  ;;  %v1299_v49 = vmul.f32 0.5, %v1259_v10  ;;  %v1261_v26 = vsub.f32 %v2764_v14, %v1245_v47  ;;  %v1278_v55 = vrot.slane %v2773_v28, 7 }
 0x391   :  { %v1293_v53 = vsub.f32 %v2817_v44, %v1277_v57  ;;  %v1149_v45 = vpop.permute.xlu1 %1148  ;;  %v1295_v31 = vsub.f32 %v2871_v61, %v1279_v58 }
 0x392   :  { %1537 = vrot.lane.b32.xlu2 %v1516_v63, %s1896_s29  ;;  %1848 = vtanh.f32 %v1299_v49  ;;  %v1301_v23 = vmul.f32 0.5, %v1261_v26  ;;  %v1294_v14 = vsub.f32 %v2773_v28, %v1278_v55  ;;  %v1178_v3 = vsel %vm1006_vm15, %v1149_v45, 0.0 }
 0x393   :  { %1850 = vtanh.f32 %v1317_v38  ;;  %v1319_v63 = vmul.f32 %v2936_v59, %v1293_v53  ;;  %v1321_v5 = vmul.f32 %v2936_v59, %v1295_v31 }
 0x394   :  { %v1845_v41 = vpop.eup %1844  ;;  %1852 = vtanh.f32 %v1298_v24  ;;  %v1320_v56 = vmul.f32 %v2936_v59, %v1294_v14 }
 0x395   :  { %v1847_v46 = vpop.eup %1846  ;;  %v1509_v43 = vmul.f32 %v1845_v41, %v1841_v19  ;;  %1854 = vtanh.f32 %v1316_v54  ;;  %v1246_v19 = vrot.slane %v2859_v22, 7  ;;  %v1303_v54 = vmul.f32 0.5, %v1263_v30 }
 0x396   :  { %v1510_v9 = vmul.f32 %v1847_v46, %v1843_v13  ;;  %1856 = vtanh.f32 %v1300_v7  ;;  %v1151_v46 = vpop.permute.xlu2 %1150  ;;  %v1265_v7 = vsub.f32 %v2880_v51, %v1249_v17 }
 0x397   :  { %v1517_v6 = vmul.f32 %v1509_v43, %v1509_v43  ;;  %1858 = vtanh.f32 %v1318_v12  ;;  %v1262_v44 = vsub.f32 %v2859_v22, %v1246_v19  ;;  %v1181_v27 = vsel %vm1006_vm15, %v1151_v46, 0.0 }
 0x398   :  { %v1518_v40 = vmul.f32 %v1510_v9, %v1510_v9  ;;  %v1849_v39 = vpop.eup %1848  ;;  %1860 = vtanh.f32 %v1301_v23  ;;  %v1305_v53 = vmul.f32 0.5, %v1265_v7 }
 0x399   :  { %1539 = vrot.lane.b32.xlu0 %v1517_v6, %s1896_s29  ;;  %v1851_v18 = vpop.eup %1850  ;;  %1862 = vtanh.f32 %v1319_v63  ;;  %v1302_v10 = vmul.f32 0.5, %v1262_v44 }
 0x39a   :  { %1541 = vrot.lane.b32.xlu1 %v1518_v40, %s1896_s29  ;;  %v1333_v16 = vmul.f32 %v1851_v18, %v1849_v39  ;;  %v1853_v20 = vpop.eup %1852  ;;  %1864 = vtanh.f32 %v1320_v56 }
 0x39b   :  { %v1855_v37 = vpop.eup %1854  ;;  %1866 = vtanh.f32 %v1302_v10 }
 0x39c   :  { %v1341_v11 = vmul.f32 %v1333_v16, %v1333_v16  ;;  %v1332_v42 = vmul.f32 %v1855_v37, %v1853_v20  ;;  %v1857_v13 = vpop.eup %1856  ;;  %v1248_v16 = vrot.slane %v2783_v25, 7  ;;  %1868 = vtanh.f32 %v1303_v54 }
 0x39d   :  { %v1859_v41 = vpop.eup %1858  ;;  %1870 = vtanh.f32 %v1321_v5 }
 0x39e   :  { %v1352_v29 = vsel %vm1348_vm0, %v1341_v11, 0.0  ;;  %v1340_v62 = vmul.f32 %v1332_v42, %v1332_v42  ;;  %v1334_v9 = vmul.f32 %v1859_v41, %v1857_v13  ;;  %v1861_v22 = vpop.eup %1860 }
 0x39f   :  { %v1863_v38 = vpop.eup %1862 }
 0x3a0   :  { %v1349_v21 = vsel %vm1348_vm0, %v1340_v62, 0.0  ;;  %v1342_v49 = vmul.f32 %v1334_v9, %v1334_v9  ;;  %v1335_v18 = vmul.f32 %v1863_v38, %v1861_v22  ;;  %v1865_v11 = vpop.eup %1864 }
 0x3a1   :  { %v1867_v61 = vpop.eup %1866 }
 0x3a2   :  { %v1355_v39 = vsel %vm1348_vm0, %v1342_v49, 0.0  ;;  %v1343_v20 = vmul.f32 %v1335_v18, %v1335_v18  ;;  %v1336_v62 = vmul.f32 %v1867_v61, %v1865_v11  ;;  %v1869_v35 = vpop.eup %1868 }
 0x3a4   :  { %v1358_v42 = vsel %vm1348_vm0, %v1343_v20, 0.0  ;;  %v1344_v60 = vmul.f32 %v1336_v62, %v1336_v62 }
 0x3a6   :  { %v1361_v57 = vsel %vm1348_vm0, %v1344_v60, 0.0 }
 0x3bb   :  { %1161 = vadd.xlane.f32.xlu2 %v1160_v0  ;;  %v1280_v0 = vrot.slane %v2843_v8, 7 }
 0x3bd   :  { %v1296_v37 = vsub.f32 %v2843_v8, %v1280_v0  ;;  %v1871_v8 = vpop.eup %1870 }
 0x3be   :  { %v1337_v12 = vmul.f32 %v1871_v8, %v1869_v35 }
 0x3bf   :  { %v1322_v52 = vmul.f32 %v2936_v59, %v1296_v37 }
 0x3c0   :  { %v1345_v45 = vmul.f32 %v1337_v12, %v1337_v12 }
 0x3c3   :  { %1353 = vadd.xlane.f32.xlu2 %v1352_v29  ;;  %1164 = vadd.xlane.f32.xlu0 %v1163_v50  ;;  %v1264_v29 = vsub.f32 %v2783_v25, %v1248_v16 }
 0x3c4   :  { %1350 = vadd.xlane.f32.xlu1 %v1349_v21 }
 0x3cb   :  { %1167 = vadd.xlane.f32.xlu2 %v1166_v1  ;;  %v1304_v1 = vmul.f32 0.5, %v1264_v29 }
 0x3cd   :  { %1872 = vtanh.f32 %v1304_v1 }
 0x3ce   :  { %1874 = vtanh.f32 %v1322_v52 }
 0x3d3   :  { %1170 = vadd.xlane.f32.xlu2 %v1169_v2  ;;  %v1281_v2 = vrot.slane %v2810_v4, 7 }
 0x3db   :  { %1173 = vadd.xlane.f32.xlu2 %v1172_v15  ;;  %v1297_v15 = vsub.f32 %v2810_v4, %v1281_v2  ;;  %v1364_v4 = vsel %vm1348_vm0, %v1345_v45, 0.0 }
 0x3dc   :  { %v1532_v34 = vpop.permute.xlu2 %1531 }
 0x3dd   :  { %v1558_v24 = vsel %vm1551_vm1, %v1532_v34, 0.0  ;;  %v1323_v26 = vmul.f32 %v2936_v59, %v1297_v15 }
 0x3df   :  { %1876 = vtanh.f32 %v1323_v26 }
 0x3e0   :  { %1878 = vtanh.f32 %v1305_v53 }
 0x3e3   :  { %1176 = vadd.xlane.f32.xlu2 %v1175_v32  ;;  %v1873_v32 = vpop.eup %1872 }
 0x3e4   :  { %v1875_v23 = vpop.eup %1874 }
 0x3e5   :  { %v1338_v63 = vmul.f32 %v1875_v23, %v1873_v32  ;;  %v1877_v19 = vpop.eup %1876 }
 0x3e6   :  { %v1879_v59 = vpop.eup %1878 }
 0x3e7   :  { %v1346_v41 = vmul.f32 %v1338_v63, %v1338_v63  ;;  %v1339_v44 = vmul.f32 %v1879_v59, %v1877_v19 }
 0x3e9   :  { %v1367_v46 = vsel %vm1348_vm0, %v1346_v41, 0.0 }
 0x3eb   :  { %1179 = vadd.xlane.f32.xlu2 %v1178_v3  ;;  %v1530_v43 = vpop.permute.xlu1 %1529 }
 0x3ec   :  { %v1528_v6 = vpop.permute.xlu0 %1527  ;;  %v1555_v40 = vsel %vm1551_vm1, %v1530_v43, 0.0  ;;  %v1538_v55 = vpop.permute.xlu2 %1537  ;;  %v1347_v43 = vmul.f32 %v1339_v44, %v1339_v44 }
 0x3ed   :  { %1556 = vadd.xlane.f32.xlu1 %v1555_v40  ;;  %v1552_v28 = vsel %vm1551_vm1, %v1528_v6, 0.0  ;;  %v1567_v51 = vsel %vm1551_vm1, %v1538_v55, 0.0 }
 0x3ee   :  { %1553 = vadd.xlane.f32.xlu0 %v1552_v28  ;;  %v1370_v6 = vsel %vm1348_vm0, %v1347_v43, 0.0 }
 0x3f3   :  { %1182 = vadd.xlane.f32.xlu2 %v1181_v27 }
 0x3f5   :  { %1559 = vadd.xlane.f32.xlu1 %v1558_v24 }
 0x3f6   :  { %1356 = vadd.xlane.f32.xlu0 %v1355_v39 }
 0x3fb   :  { %v1534_v50 = vpop.permute.xlu0 %1533 }
 0x3fc   :  { %v1561_v21 = vsel %vm1551_vm1, %v1534_v50, 0.0  ;;  %v1536_v25 = vpop.permute.xlu1 %1535 }
 0x3fd   :  { %1562 = vadd.xlane.f32.xlu1 %v1561_v21  ;;  %v1564_v47 = vsel %vm1551_vm1, %v1536_v25, 0.0 }
 0x3fe   :  { %1359 = vadd.xlane.f32.xlu0 %v1358_v42 }
 0x405   :  { %1565 = vadd.xlane.f32.xlu1 %v1564_v47 }
 0x406   :  { %1362 = vadd.xlane.f32.xlu0 %v1361_v57 }
 0x40b   :  { %v1540_v13 = vpop.permute.xlu0 %1539 }
 0x40c   :  { %v1570_v14 = vsel %vm1551_vm1, %v1540_v13, 0.0  ;;  %v1542_v3 = vpop.permute.xlu1 %1541 }
 0x40d   :  { %1568 = vadd.xlane.f32.xlu1 %v1567_v51  ;;  %v1573_v9 = vsel %vm1551_vm1, %v1542_v3, 0.0 }
 0x40e   :  { %1365 = vadd.xlane.f32.xlu0 %v1364_v4 }
 0x415   :  { %1571 = vadd.xlane.f32.xlu1 %v1570_v14 }
 0x416   :  { %1368 = vadd.xlane.f32.xlu0 %v1367_v46 }
 0x41d   :  { %1574 = vadd.xlane.f32.xlu1 %v1573_v9 }
 0x41e   :  { %1371 = vadd.xlane.f32.xlu0 %v1370_v6 }
 0x42e   :  { %v1162_v40 = vpop.xlane.xlu2 %1161 }
 0x42f   :  { %v1192_v27 = vperm.slane %v1162_v40, %v2376_v48 }
 0x436   :  { %v1354_v56 = vpop.xlane.xlu2 %1353  ;;  %v1165_v49 = vpop.xlane.xlu0 %1164 }
 0x437   :  { %v1351_v22 = vpop.xlane.xlu1 %1350  ;;  %v1193_v30 = vperm.slane %v1165_v49, %v2376_v48  ;;  %v1382_v57 = vperm.slane %v1354_v56, %v2396_v36 }
 0x438   :  { %v1381_v12 = vperm.slane %v1351_v22, %v2396_v36 }
 0x439   :  { %v1200_v54 = vsel %vm406_vm4, %v1193_v30, %v1192_v27 }
 0x43a   :  { %v1389_v51 = vsel %vm406_vm4, %v1382_v57, %v1381_v12 }
 0x43e   :  { %v1168_v33 = vpop.xlane.xlu2 %1167 }
 0x43f   :  { %v1194_v34 = vperm.slane %v1168_v33, %v2376_v48 }
 0x441   :  { %v1201_v0 = vsel %vm408_vm5, %v1194_v34, %v1200_v54 }
 0x446   :  { %v1171_v28 = vpop.xlane.xlu2 %1170 }
 0x447   :  { %v1195_v39 = vperm.slane %v1171_v28, %v2376_v48 }
 0x449   :  { %v1202_v11 = vsel %vm410_vm6, %v1195_v39, %v1201_v0 }
 0x44e   :  { %v1174_v10 = vpop.xlane.xlu2 %1173 }
 0x44f   :  { %v1196_v24 = vperm.slane %v1174_v10, %v2376_v48 }
 0x451   :  { %v1203_v20 = vsel %vm412_vm7, %v1196_v24, %v1202_v11 }
 0x456   :  { %v1177_v58 = vpop.xlane.xlu2 %1176 }
 0x457   :  { %v1197_v16 = vperm.slane %v1177_v58, %v2376_v48 }
 0x459   :  { %v1204_v29 = vsel %vm414_vm8, %v1197_v16, %v1203_v20 }
 0x45e   :  { %v1180_v38 = vpop.xlane.xlu2 %1179 }
 0x45f   :  { %v1198_v5 = vperm.slane %v1180_v38, %v2376_v48 }
 0x460   :  { %v1557_v31 = vpop.xlane.xlu1 %1556 }
 0x461   :  { %v1554_v18 = vpop.xlane.xlu0 %1553  ;;  %v1205_v42 = vsel %vm416_vm9, %v1198_v5, %v1204_v29  ;;  %v1585_v15 = vperm.slane %v1557_v31, %v2376_v48 }
 0x462   :  { %v1584_v7 = vperm.slane %v1554_v18, %v2376_v48 }
 0x464   :  { %v1592_v55 = vsel %vm406_vm4, %v1585_v15, %v1584_v7  ;;  %vm1397_vm4 = vcmask 23552  }
 0x466   :  { %v1183_v61 = vpop.xlane.xlu2 %1182 }
 0x467   :  { %v1199_v37 = vperm.slane %v1183_v61, %v2376_v48 }
 0x468   :  { %v1560_v50 = vpop.xlane.xlu1 %1559 }
 0x469   :  { %v1357_v62 = vpop.xlane.xlu0 %1356  ;;  %v1206_v21 = vsel %vm418_vm10, %v1199_v37, %v1205_v42  ;;  %v1586_v26 = vperm.slane %v1560_v50, %v2376_v48 }
 0x46a   :  { %v1209_v1 = vsel %vm1208_vm2, %v1206_v21, 0.0  ;;  %v1383_v53 = vperm.slane %v1357_v62, %v2396_v36 }
 0x46b   :  { %1210 = vadd.xlane.f32.xlu2 %v1209_v1  ;;  %v1593_v19 = vsel %vm408_vm5, %v1586_v26, %v1592_v55 }
 0x46c   :  { %v1390_v59 = vsel %vm408_vm5, %v1383_v53, %v1389_v51 }
 0x470   :  { %v1563_v2 = vpop.xlane.xlu1 %1562 }
 0x471   :  { %v1360_v52 = vpop.xlane.xlu0 %1359  ;;  %v1587_v32 = vperm.slane %v1563_v2, %v2376_v48 }
 0x472   :  { %v1384_v45 = vperm.slane %v1360_v52, %v2396_v36 }
 0x473   :  { %v1594_v14 = vsel %vm410_vm6, %v1587_v32, %v1593_v19 }
 0x474   :  { %v1391_v44 = vsel %vm410_vm6, %v1384_v45, %v1390_v59 }
 0x478   :  { %v1566_v17 = vpop.xlane.xlu1 %1565 }
 0x479   :  { %v1363_v35 = vpop.xlane.xlu0 %1362  ;;  %v1588_v23 = vperm.slane %v1566_v17, %v2376_v48 }
 0x47a   :  { %v1385_v4 = vperm.slane %v1363_v35, %v2396_v36 }
 0x47b   :  { %v1595_v3 = vsel %vm412_vm7, %v1588_v23, %v1594_v14 }
 0x47c   :  { %v1392_v9 = vsel %vm412_vm7, %v1385_v4, %v1391_v44 }
 0x480   :  { %v1569_v25 = vpop.xlane.xlu1 %1568 }
 0x481   :  { %v1366_v60 = vpop.xlane.xlu0 %1365  ;;  %v1589_v63 = vperm.slane %v1569_v25, %v2376_v48 }
 0x482   :  { %v1386_v13 = vperm.slane %v1366_v60, %v2396_v36 }
 0x483   :  { %v1596_v6 = vsel %vm414_vm8, %v1589_v63, %v1595_v3 }
 0x484   :  { %v1393_v33 = vsel %vm414_vm8, %v1386_v13, %v1392_v9 }
 0x488   :  { %v1572_v8 = vpop.xlane.xlu1 %1571 }
 0x489   :  { %v1369_v47 = vpop.xlane.xlu0 %1368  ;;  %v1590_v41 = vperm.slane %v1572_v8, %v2376_v48 }
 0x48a   :  { %v1387_v46 = vperm.slane %v1369_v47, %v2396_v36 }
 0x48b   :  { %v1597_v10 = vsel %vm416_vm9, %v1590_v41, %v1596_v6 }
 0x48c   :  { %v1394_v22 = vsel %vm416_vm9, %v1387_v46, %v1393_v33 }
 0x490   :  { %v1575_v43 = vpop.xlane.xlu1 %1574 }
 0x491   :  { %v1591_v40 = vperm.slane %v1575_v43, %v2376_v48  ;;  %v1372_v56 = vpop.xlane.xlu0 %1371 }
 0x492   :  { %v1388_v28 = vperm.slane %v1372_v56, %v2396_v36 }
 0x493   :  { %v1598_v58 = vsel %vm418_vm10, %v1591_v40, %v1597_v10 }
 0x494   :  { %v1601_v49 = vsel %vm1600_vm3, %v1598_v58, 0.0  ;;  %v1395_v38 = vsel %vm418_vm10, %v1388_v28, %v1394_v22 }
 0x495   :  { %1602 = vadd.xlane.f32.xlu1 %v1601_v49  ;;  %v1398_v30 = vsel %vm1397_vm4, %v1395_v38, 0.0 }
 0x496   :  { %1399 = vadd.xlane.f32.xlu0 %v1398_v30 }
 0x4de   :  { %v1211_v34 = vpop.xlane.xlu2 %1210 }
 0x4df   :  { %v1213_v31 = vperm.slane %v1211_v34, %v2376_v48 }
 0x4e1   :  { %1215 = vst.msk [vmem:[%s3072_s8 + $0x1] sm:$0x1] %vm428_vm12, %v1213_v31 }
 0x508   :  { %v1603_v36 = vpop.xlane.xlu1 %1602 }
 0x509   :  { %v1605_v27 = vperm.slane %v1603_v36, %v2376_v48  ;;  %v1400_v39 = vpop.xlane.xlu0 %1399 }
 0x50a   :  { %v1402_v18 = vperm.slane %v1400_v39, %v2376_v48 }
 0x50b   :  { %1607 = vst.msk [vmem:[%s3072_s8 + $0x2] sm:$0x1] %vm428_vm12, %v1605_v27 }
 0x50c   :  { %1404 = vst.msk [vmem:[%s3071_s7 + $0x2] sm:$0x1] %vm428_vm12, %v1402_v18 }

</bundles_post_ra>
